<compile_context>
chip_gen: v6e
topology: v6e:2x2x1
jax: 0.10.0
libtpu: 0.0.40
codegen_flags: <defaults>
</compile_context>

<pallas_src>
import math
import functools

import numpy as np
import jax
import jax.numpy as jnp
from jax import lax
from jax.experimental import pallas as pl
from jax.experimental.pallas import tpu as pltpu


# ----------------------------- in-kernel math ------------------------------

def _layernorm(x, gamma, beta, eps=1e-5):
    mean = jnp.mean(x, axis=-1, keepdims=True)
    var = jnp.mean((x - mean) ** 2, axis=-1, keepdims=True)
    return (x - mean) * lax.rsqrt(var + eps) * gamma + beta


def encoder_kernel(nhead,
                   x_ref, wqkv_ref, bqkv_ref, wo_ref,
                   w1_ref, b1_ref, w2_ref, vecs_ref,
                   out_ref):
    """One batch element through all encoder layers.

    x_ref:    (1, T, D) activation block
    wqkv_ref: (L, D, 6D)  packed [cm_q*s | cm_k | cm_v | sa_q*s | sa_k | sa_v]
    bqkv_ref: (L, 1, 6D)  matching packed biases (q biases pre-scaled)
    wo_ref:   (L, 2D, D)  [cm_out_w.T ; sa_out_w.T]
    w1_ref:   (L, D, dff)   b1_ref: (L, 1, dff)   w2_ref: (L, dff, D)
    vecs_ref: (L, 6, D)   rows = [bo_cm+bo_sa, b2, ln1_w, ln1_b, ln2_w, ln2_b]
    """
    x = x_ref[0]                      # (T, D)
    T, D = x.shape
    hd = D // nhead
    num_layers = wqkv_ref.shape[0]

    for l in range(num_layers):       # static unroll over layers
        wqkv = wqkv_ref[l]            # (D, 6D)
        bqkv = bqkv_ref[l]            # (1, 6D)
        wo = wo_ref[l]                # (2D, D)
        w1 = w1_ref[l]                # (D, dff)
        b1 = b1_ref[l]                # (1, dff)
        w2 = w2_ref[l]                # (dff, D)
        vecs = vecs_ref[l]            # (6, D)

        # One wide matmul for all six projections (cross q/k/v, self q/k/v).
        proj = jnp.dot(x, wqkv, preferred_element_type=jnp.float32) + bqkv

        # Accumulate output projections of both attentions per head (no concat).
        acc = jnp.zeros((T, D), jnp.float32)
        for a in range(2):            # 0: cross-modal attn, 1: self attn
            base = 3 * D * a
            for h in range(nhead):    # static unroll over heads
                q = proj[:, base + h * hd: base + (h + 1) * hd]            # (T, hd)
                k = proj[:, base + D + h * hd: base + D + (h + 1) * hd]    # (T, hd)
                v = proj[:, base + 2 * D + h * hd: base + 2 * D + (h + 1) * hd]
                # scores (T, T): contract on head dim, no explicit transpose
                s = lax.dot_general(q, k, (((1,), (1,)), ((), ())),
                                    preferred_element_type=jnp.float32)
                s = s - jnp.max(s, axis=-1, keepdims=True)
                p = jnp.exp(s)
                p = p * pl.reciprocal(jnp.sum(p, axis=-1, keepdims=True),
                                      approx=True)
                head = jnp.dot(p, v, preferred_element_type=jnp.float32)   # (T, hd)
                acc = acc + jnp.dot(head,
                                    wo[a * D + h * hd: a * D + (h + 1) * hd, :],
                                    preferred_element_type=jnp.float32)

        # residual + LN1 (vecs[0] = summed output-proj biases)
        x = _layernorm(x + acc + vecs[0], vecs[2], vecs[3])

        # feed-forward: linear1 -> relu -> linear2, residual + LN2
        ff = jnp.maximum(
            jnp.dot(x, w1, preferred_element_type=jnp.float32) + b1, 0.0)
        ff = jnp.dot(ff, w2, preferred_element_type=jnp.float32) + vecs[1]
        x = _layernorm(x + ff, vecs[4], vecs[5])

    # TODO(synk): the PyTorch forward also returns `attn`, which is undefined
    # in the with_ca=True branch of the original code; only output_a is produced.
    out_ref[0] = x.astype(out_ref.dtype)


# ------------------------------ host wrapper -------------------------------

def self_encoder(src, packed, nhead):
    """src: (B, T, D) float32.  packed: dict of layer-stacked weights."""
    B, T, D = src.shape
    weights = [packed["wqkv"], packed["bqkv"], packed["wo"],
               packed["w1"], packed["b1"], packed["w2"], packed["vecs"]]

    act_spec = pl.BlockSpec((1, T, D), lambda b: (b, 0, 0))

    def full_spec(a):
        nd = a.ndim
        return pl.BlockSpec(a.shape, lambda b, _nd=nd: (0,) * _nd)

    return pl.pallas_call(
        functools.partial(encoder_kernel, nhead),
        out_shape=jax.ShapeDtypeStruct((B, T, D), jnp.float32),
        grid=(B,),
        in_specs=[act_spec] + [full_spec(a) for a in weights],
        out_specs=pl.BlockSpec((1, T, D), lambda b: (b, 0, 0)),
        compiler_params=pltpu.CompilerParams(
            dimension_semantics=("parallel",)),   # 2x on v7x (2 TCs); no-op v5e/v6e
    )(src, *weights)


# --------------------------- parameter creation ----------------------------

def init_layer_params(key, d_model, nhead, dff):
    """PyTorch-layout parameters for one Self_HANLayer."""
    ks = jax.random.split(key, 16)
    s = 0.05

    def w(k, shape):
        return jax.random.normal(k, shape, jnp.float32) * s

    return dict(
        cm_in_w=w(ks[0], (3 * d_model, d_model)), cm_in_b=w(ks[1], (3 * d_model,)),
        cm_out_w=w(ks[2], (d_model, d_model)), cm_out_b=w(ks[3], (d_model,)),
        sa_in_w=w(ks[4], (3 * d_model, d_model)), sa_in_b=w(ks[5], (3 * d_model,)),
        sa_out_w=w(ks[6], (d_model, d_model)), sa_out_b=w(ks[7], (d_model,)),
        w1=w(ks[8], (dff, d_model)), b1=w(ks[9], (dff,)),
        w2=w(ks[10], (d_model, dff)), b2=w(ks[11], (d_model,)),
        ln1_w=1.0 + w(ks[12], (d_model,)), ln1_b=w(ks[13], (d_model,)),
        ln2_w=1.0 + w(ks[14], (d_model,)), ln2_b=w(ks[15], (d_model,)),
    )


def pack_params(layer_params, nhead):
    """Pack PyTorch-layout per-layer params into layer-stacked kernel operands."""
    d_model = layer_params[0]["cm_in_w"].shape[1]
    hd = d_model // nhead
    scale = 1.0 / math.sqrt(hd)

    wqkv, bqkv, wo, w1, b1, w2, vecs = [], [], [], [], [], [], []
    for p in layer_params:
        cm_q_w, cm_k_w, cm_v_w = jnp.split(p["cm_in_w"], 3, axis=0)
        sa_q_w, sa_k_w, sa_v_w = jnp.split(p["sa_in_w"], 3, axis=0)
        cm_q_b, cm_k_b, cm_v_b = jnp.split(p["cm_in_b"], 3)
        sa_q_b, sa_k_b, sa_v_b = jnp.split(p["sa_in_b"], 3)
        # transpose to (in, out), fold softmax scale into the q columns/bias
        wqkv.append(jnp.concatenate(
            [cm_q_w.T * scale, cm_k_w.T, cm_v_w.T,
             sa_q_w.T * scale, sa_k_w.T, sa_v_w.T], axis=1))          # (D, 6D)
        bqkv.append(jnp.concatenate(
            [cm_q_b * scale, cm_k_b, cm_v_b,
             sa_q_b * scale, sa_k_b, sa_v_b])[None, :])               # (1, 6D)
        wo.append(jnp.concatenate([p["cm_out_w"].T, p["sa_out_w"].T], axis=0))  # (2D, D)
        vecs.append(jnp.stack([p["cm_out_b"] + p["sa_out_b"], p["b2"],
                               p["ln1_w"], p["ln1_b"],
                               p["ln2_w"], p["ln2_b"]], axis=0))      # (6, D)
        w1.append(p["w1"].T)                                          # (D, dff)
        b1.append(p["b1"][None, :])                                   # (1, dff)
        w2.append(p["w2"].T)                                          # (dff, D)

    return dict(wqkv=jnp.stack(wqkv), bqkv=jnp.stack(bqkv), wo=jnp.stack(wo),
                w1=jnp.stack(w1), b1=jnp.stack(b1), w2=jnp.stack(w2),
                vecs=jnp.stack(vecs))


# ------------------------------ JAX reference ------------------------------

def _mha_ref(x_q, x_kv, in_w, in_b, out_w, out_b, nhead):
    T, D = x_q.shape
    hd = D // nhead
    wq, wk, wv = jnp.split(in_w, 3, axis=0)
    bq, bk, bv = jnp.split(in_b, 3)
    q = (x_q @ wq.T + bq).reshape(T, nhead, hd).transpose(1, 0, 2) / math.sqrt(hd)
    k = (x_kv @ wk.T + bk).reshape(T, nhead, hd).transpose(1, 0, 2)
    v = (x_kv @ wv.T + bv).reshape(T, nhead, hd).transpose(1, 0, 2)
    s = jnp.einsum("hqd,hkd->hqk", q, k)
    p = jax.nn.softmax(s, axis=-1)
    o = jnp.einsum("hqk,hkd->hqd", p, v).transpose(1, 0, 2).reshape(T, D)
    return o @ out_w.T + out_b


def _ln_ref(x, g, b, eps=1e-5):
    m = x.mean(-1, keepdims=True)
    v = ((x - m) ** 2).mean(-1, keepdims=True)
    return (x - m) / jnp.sqrt(v + eps) * g + b


def encoder_ref(src, layer_params, nhead):
    def one(x):
        for p in layer_params:
            s1 = _mha_ref(x, x, p["cm_in_w"], p["cm_in_b"],
                          p["cm_out_w"], p["cm_out_b"], nhead)
            s2 = _mha_ref(x, x, p["sa_in_w"], p["sa_in_b"],
                          p["sa_out_w"], p["sa_out_b"], nhead)
            x = _ln_ref(x + s1 + s2, p["ln1_w"], p["ln1_b"])
            ff = jnp.maximum(x @ p["w1"].T + p["b1"], 0.0) @ p["w2"].T + p["b2"]
            x = _ln_ref(x + ff, p["ln2_w"], p["ln2_b"])
        return x
    return jax.vmap(one)(src)


# ---------------------------------- main -----------------------------------

if __name__ == "__main__":
    B, T, D_MODEL, NHEAD, DFF, NUM_LAYERS = 2, 8, 32, 4, 64, 2

    key = jax.random.PRNGKey(0)
    k_x, *k_layers = jax.random.split(key, NUM_LAYERS + 1)
    src_a = jax.random.normal(k_x, (B, T, D_MODEL), jnp.float32)
    layer_params = [init_layer_params(k, D_MODEL, NHEAD, DFF) for k in k_layers]
    packed = pack_params(layer_params, NHEAD)

    out = jax.block_until_ready(self_encoder(src_a, packed, NHEAD))
    ref = jax.block_until_ready(encoder_ref(src_a, layer_params, NHEAD))

    # approx=True softmax reciprocal -> slightly looser tolerance than f32-exact
    np.testing.assert_allclose(np.asarray(out), np.asarray(ref),
                               rtol=2e-3, atol=2e-3)

    print("KERNEL_OK")
</pallas_src>

<mosaic_0001>
module attributes {stable_mosaic.version = 11 : i64} {
  func.func @encoder_kernel(%arg0: i32, %arg1: memref<1x8x32xf32, #tpu.memory_space<vmem>>, %arg2: memref<2x32x192xf32, #tpu.memory_space<vmem>>, %arg3: memref<2x1x192xf32, #tpu.memory_space<vmem>>, %arg4: memref<2x64x32xf32, #tpu.memory_space<vmem>>, %arg5: memref<2x32x64xf32, #tpu.memory_space<vmem>>, %arg6: memref<2x1x64xf32, #tpu.memory_space<vmem>>, %arg7: memref<2x64x32xf32, #tpu.memory_space<vmem>>, %arg8: memref<2x6x32xf32, #tpu.memory_space<vmem>>, %arg9: memref<1x8x32xf32, #tpu.memory_space<vmem>>) attributes {dimension_semantics = [#tpu.dimension_semantics<parallel>], iteration_bounds = array<i64: 2>, scalar_prefetch = 0 : i64, scratch_operands = 0 : i64, tpu.core_type = #tpu.core_type<tc>, window_params = [{transform_indices = @transform_0, window_bounds = array<i64: 1, 8, 32>}, {pipeline_mode = #tpu.pipeline_mode<synchronous>, transform_indices = @transform_1, window_bounds = array<i64: 2, 32, 192>}, {pipeline_mode = #tpu.pipeline_mode<synchronous>, transform_indices = @transform_2, window_bounds = array<i64: 2, 1, 192>}, {pipeline_mode = #tpu.pipeline_mode<synchronous>, transform_indices = @transform_3, window_bounds = array<i64: 2, 64, 32>}, {pipeline_mode = #tpu.pipeline_mode<synchronous>, transform_indices = @transform_4, window_bounds = array<i64: 2, 32, 64>}, {pipeline_mode = #tpu.pipeline_mode<synchronous>, transform_indices = @transform_5, window_bounds = array<i64: 2, 1, 64>}, {pipeline_mode = #tpu.pipeline_mode<synchronous>, transform_indices = @transform_6, window_bounds = array<i64: 2, 64, 32>}, {pipeline_mode = #tpu.pipeline_mode<synchronous>, transform_indices = @transform_7, window_bounds = array<i64: 2, 6, 32>}, {transform_indices = @transform_8, window_bounds = array<i64: 1, 8, 32>}]} {
    %c0 = arith.constant 0 : index
    %c0_0 = arith.constant 0 : index
    %c0_1 = arith.constant 0 : index
    %0 = vector.load %arg1[%c0, %c0_0, %c0_1] : memref<1x8x32xf32, #tpu.memory_space<vmem>>, vector<1x8x32xf32>
    %1 = vector.shape_cast %0 : vector<1x8x32xf32> to vector<8x32xf32>
    %c0_2 = arith.constant 0 : index
    %c0_3 = arith.constant 0 : index
    %c0_4 = arith.constant 0 : index
    %2 = vector.load %arg2[%c0_2, %c0_3, %c0_4] : memref<2x32x192xf32, #tpu.memory_space<vmem>>, vector<1x32x192xf32>
    %3 = vector.shape_cast %2 : vector<1x32x192xf32> to vector<32x192xf32>
    %c0_5 = arith.constant 0 : index
    %c0_6 = arith.constant 0 : index
    %c0_7 = arith.constant 0 : index
    %4 = vector.load %arg3[%c0_5, %c0_6, %c0_7] : memref<2x1x192xf32, #tpu.memory_space<vmem>>, vector<1x1x192xf32>
    %5 = vector.shape_cast %4 : vector<1x1x192xf32> to vector<1x192xf32>
    %c0_8 = arith.constant 0 : index
    %c0_9 = arith.constant 0 : index
    %c0_10 = arith.constant 0 : index
    %6 = vector.load %arg4[%c0_8, %c0_9, %c0_10] : memref<2x64x32xf32, #tpu.memory_space<vmem>>, vector<1x64x32xf32>
    %7 = vector.shape_cast %6 : vector<1x64x32xf32> to vector<64x32xf32>
    %c0_11 = arith.constant 0 : index
    %c0_12 = arith.constant 0 : index
    %c0_13 = arith.constant 0 : index
    %8 = vector.load %arg5[%c0_11, %c0_12, %c0_13] : memref<2x32x64xf32, #tpu.memory_space<vmem>>, vector<1x32x64xf32>
    %9 = vector.shape_cast %8 : vector<1x32x64xf32> to vector<32x64xf32>
    %c0_14 = arith.constant 0 : index
    %c0_15 = arith.constant 0 : index
    %c0_16 = arith.constant 0 : index
    %10 = vector.load %arg6[%c0_14, %c0_15, %c0_16] : memref<2x1x64xf32, #tpu.memory_space<vmem>>, vector<1x1x64xf32>
    %11 = vector.shape_cast %10 : vector<1x1x64xf32> to vector<1x64xf32>
    %c0_17 = arith.constant 0 : index
    %c0_18 = arith.constant 0 : index
    %c0_19 = arith.constant 0 : index
    %12 = vector.load %arg7[%c0_17, %c0_18, %c0_19] : memref<2x64x32xf32, #tpu.memory_space<vmem>>, vector<1x64x32xf32>
    %13 = vector.shape_cast %12 : vector<1x64x32xf32> to vector<64x32xf32>
    %c0_20 = arith.constant 0 : index
    %c0_21 = arith.constant 0 : index
    %c0_22 = arith.constant 0 : index
    %14 = vector.load %arg8[%c0_20, %c0_21, %c0_22] : memref<2x6x32xf32, #tpu.memory_space<vmem>>, vector<1x6x32xf32>
    %15 = vector.shape_cast %14 : vector<1x6x32xf32> to vector<6x32xf32>
    %cst = arith.constant dense<0.000000e+00> : vector<8x192xf32>
    %16 = tpu.matmul %1, %3, %cst {dimension_numbers = #tpu.dot_dimension_numbers<[1], [0], [0], [1], [0, 0, 1, 1], [], []>} : vector<8x32xf32>, vector<32x192xf32>, vector<8x192xf32> -> vector<8x192xf32>
    %17 = vector.broadcast %5 : vector<1x192xf32> to vector<8x192xf32>
    %18 = arith.addf %16, %17 : vector<8x192xf32>
    %cst_23 = arith.constant 0.000000e+00 : f32
    %19 = vector.broadcast %cst_23 : f32 to vector<8x32xf32>
    %20 = vector.extract_strided_slice %18 {offsets = [0, 0], sizes = [8, 8], strides = [1, 1]} : vector<8x192xf32> to vector<8x8xf32>
    %21 = vector.extract_strided_slice %18 {offsets = [0, 32], sizes = [8, 8], strides = [1, 1]} : vector<8x192xf32> to vector<8x8xf32>
    %22 = vector.extract_strided_slice %18 {offsets = [0, 64], sizes = [8, 8], strides = [1, 1]} : vector<8x192xf32> to vector<8x8xf32>
    %cst_24 = arith.constant dense<0.000000e+00> : vector<8x8xf32>
    %23 = tpu.matmul %20, %21, %cst_24 {dimension_numbers = #tpu.dot_dimension_numbers<[1], [1], [0], [0], [0, 0, 1, 0], [], []>} : vector<8x8xf32>, vector<8x8xf32>, vector<8x8xf32> -> vector<8x8xf32>
    %cst_25 = arith.constant dense<0xFF800000> : vector<8xf32>
    %24 = vector.multi_reduction <maximumf>, %23, %cst_25 [1] : vector<8x8xf32> to vector<8xf32>
    %25 = vector.shape_cast %24 : vector<8xf32> to vector<8x1xf32>
    %26 = vector.broadcast %25 : vector<8x1xf32> to vector<8x8xf32>
    %27 = arith.subf %23, %26 : vector<8x8xf32>
    %28 = math.exp %27 : vector<8x8xf32>
    %cst_26 = arith.constant dense<0.000000e+00> : vector<8xf32>
    %29 = vector.multi_reduction <add>, %28, %cst_26 [1] : vector<8x8xf32> to vector<8xf32>
    %30 = vector.shape_cast %29 : vector<8xf32> to vector<8x1xf32>
    %31 = tpu.reciprocal %30 {approx = true} : vector<8x1xf32> -> vector<8x1xf32>
    %32 = vector.broadcast %31 : vector<8x1xf32> to vector<8x8xf32>
    %33 = arith.mulf %28, %32 : vector<8x8xf32>
    %cst_27 = arith.constant dense<0.000000e+00> : vector<8x8xf32>
    %34 = tpu.matmul %33, %22, %cst_27 {dimension_numbers = #tpu.dot_dimension_numbers<[1], [0], [0], [1], [0, 0, 1, 1], [], []>} : vector<8x8xf32>, vector<8x8xf32>, vector<8x8xf32> -> vector<8x8xf32>
    %35 = vector.extract_strided_slice %7 {offsets = [0, 0], sizes = [8, 32], strides = [1, 1]} : vector<64x32xf32> to vector<8x32xf32>
    %cst_28 = arith.constant dense<0.000000e+00> : vector<8x32xf32>
    %36 = tpu.matmul %34, %35, %cst_28 {dimension_numbers = #tpu.dot_dimension_numbers<[1], [0], [0], [1], [0, 0, 1, 1], [], []>} : vector<8x8xf32>, vector<8x32xf32>, vector<8x32xf32> -> vector<8x32xf32>
    %37 = arith.addf %19, %36 : vector<8x32xf32>
    %38 = vector.extract_strided_slice %18 {offsets = [0, 8], sizes = [8, 8], strides = [1, 1]} : vector<8x192xf32> to vector<8x8xf32>
    %39 = vector.extract_strided_slice %18 {offsets = [0, 40], sizes = [8, 8], strides = [1, 1]} : vector<8x192xf32> to vector<8x8xf32>
    %40 = vector.extract_strided_slice %18 {offsets = [0, 72], sizes = [8, 8], strides = [1, 1]} : vector<8x192xf32> to vector<8x8xf32>
    %cst_29 = arith.constant dense<0.000000e+00> : vector<8x8xf32>
    %41 = tpu.matmul %38, %39, %cst_29 {dimension_numbers = #tpu.dot_dimension_numbers<[1], [1], [0], [0], [0, 0, 1, 0], [], []>} : vector<8x8xf32>, vector<8x8xf32>, vector<8x8xf32> -> vector<8x8xf32>
    %cst_30 = arith.constant dense<0xFF800000> : vector<8xf32>
    %42 = vector.multi_reduction <maximumf>, %41, %cst_30 [1] : vector<8x8xf32> to vector<8xf32>
    %43 = vector.shape_cast %42 : vector<8xf32> to vector<8x1xf32>
    %44 = vector.broadcast %43 : vector<8x1xf32> to vector<8x8xf32>
    %45 = arith.subf %41, %44 : vector<8x8xf32>
    %46 = math.exp %45 : vector<8x8xf32>
    %cst_31 = arith.constant dense<0.000000e+00> : vector<8xf32>
    %47 = vector.multi_reduction <add>, %46, %cst_31 [1] : vector<8x8xf32> to vector<8xf32>
    %48 = vector.shape_cast %47 : vector<8xf32> to vector<8x1xf32>
    %49 = tpu.reciprocal %48 {approx = true} : vector<8x1xf32> -> vector<8x1xf32>
    %50 = vector.broadcast %49 : vector<8x1xf32> to vector<8x8xf32>
    %51 = arith.mulf %46, %50 : vector<8x8xf32>
    %cst_32 = arith.constant dense<0.000000e+00> : vector<8x8xf32>
    %52 = tpu.matmul %51, %40, %cst_32 {dimension_numbers = #tpu.dot_dimension_numbers<[1], [0], [0], [1], [0, 0, 1, 1], [], []>} : vector<8x8xf32>, vector<8x8xf32>, vector<8x8xf32> -> vector<8x8xf32>
    %53 = vector.extract_strided_slice %7 {offsets = [8, 0], sizes = [8, 32], strides = [1, 1]} : vector<64x32xf32> to vector<8x32xf32>
    %cst_33 = arith.constant dense<0.000000e+00> : vector<8x32xf32>
    %54 = tpu.matmul %52, %53, %cst_33 {dimension_numbers = #tpu.dot_dimension_numbers<[1], [0], [0], [1], [0, 0, 1, 1], [], []>} : vector<8x8xf32>, vector<8x32xf32>, vector<8x32xf32> -> vector<8x32xf32>
    %55 = arith.addf %37, %54 : vector<8x32xf32>
    %56 = vector.extract_strided_slice %18 {offsets = [0, 16], sizes = [8, 8], strides = [1, 1]} : vector<8x192xf32> to vector<8x8xf32>
    %57 = vector.extract_strided_slice %18 {offsets = [0, 48], sizes = [8, 8], strides = [1, 1]} : vector<8x192xf32> to vector<8x8xf32>
    %58 = vector.extract_strided_slice %18 {offsets = [0, 80], sizes = [8, 8], strides = [1, 1]} : vector<8x192xf32> to vector<8x8xf32>
    %cst_34 = arith.constant dense<0.000000e+00> : vector<8x8xf32>
    %59 = tpu.matmul %56, %57, %cst_34 {dimension_numbers = #tpu.dot_dimension_numbers<[1], [1], [0], [0], [0, 0, 1, 0], [], []>} : vector<8x8xf32>, vector<8x8xf32>, vector<8x8xf32> -> vector<8x8xf32>
    %cst_35 = arith.constant dense<0xFF800000> : vector<8xf32>
    %60 = vector.multi_reduction <maximumf>, %59, %cst_35 [1] : vector<8x8xf32> to vector<8xf32>
    %61 = vector.shape_cast %60 : vector<8xf32> to vector<8x1xf32>
    %62 = vector.broadcast %61 : vector<8x1xf32> to vector<8x8xf32>
    %63 = arith.subf %59, %62 : vector<8x8xf32>
    %64 = math.exp %63 : vector<8x8xf32>
    %cst_36 = arith.constant dense<0.000000e+00> : vector<8xf32>
    %65 = vector.multi_reduction <add>, %64, %cst_36 [1] : vector<8x8xf32> to vector<8xf32>
    %66 = vector.shape_cast %65 : vector<8xf32> to vector<8x1xf32>
    %67 = tpu.reciprocal %66 {approx = true} : vector<8x1xf32> -> vector<8x1xf32>
    %68 = vector.broadcast %67 : vector<8x1xf32> to vector<8x8xf32>
    %69 = arith.mulf %64, %68 : vector<8x8xf32>
    %cst_37 = arith.constant dense<0.000000e+00> : vector<8x8xf32>
    %70 = tpu.matmul %69, %58, %cst_37 {dimension_numbers = #tpu.dot_dimension_numbers<[1], [0], [0], [1], [0, 0, 1, 1], [], []>} : vector<8x8xf32>, vector<8x8xf32>, vector<8x8xf32> -> vector<8x8xf32>
    %71 = vector.extract_strided_slice %7 {offsets = [16, 0], sizes = [8, 32], strides = [1, 1]} : vector<64x32xf32> to vector<8x32xf32>
    %cst_38 = arith.constant dense<0.000000e+00> : vector<8x32xf32>
    %72 = tpu.matmul %70, %71, %cst_38 {dimension_numbers = #tpu.dot_dimension_numbers<[1], [0], [0], [1], [0, 0, 1, 1], [], []>} : vector<8x8xf32>, vector<8x32xf32>, vector<8x32xf32> -> vector<8x32xf32>
    %73 = arith.addf %55, %72 : vector<8x32xf32>
    %74 = vector.extract_strided_slice %18 {offsets = [0, 24], sizes = [8, 8], strides = [1, 1]} : vector<8x192xf32> to vector<8x8xf32>
    %75 = vector.extract_strided_slice %18 {offsets = [0, 56], sizes = [8, 8], strides = [1, 1]} : vector<8x192xf32> to vector<8x8xf32>
    %76 = vector.extract_strided_slice %18 {offsets = [0, 88], sizes = [8, 8], strides = [1, 1]} : vector<8x192xf32> to vector<8x8xf32>
    %cst_39 = arith.constant dense<0.000000e+00> : vector<8x8xf32>
    %77 = tpu.matmul %74, %75, %cst_39 {dimension_numbers = #tpu.dot_dimension_numbers<[1], [1], [0], [0], [0, 0, 1, 0], [], []>} : vector<8x8xf32>, vector<8x8xf32>, vector<8x8xf32> -> vector<8x8xf32>
    %cst_40 = arith.constant dense<0xFF800000> : vector<8xf32>
    %78 = vector.multi_reduction <maximumf>, %77, %cst_40 [1] : vector<8x8xf32> to vector<8xf32>
    %79 = vector.shape_cast %78 : vector<8xf32> to vector<8x1xf32>
    %80 = vector.broadcast %79 : vector<8x1xf32> to vector<8x8xf32>
    %81 = arith.subf %77, %80 : vector<8x8xf32>
    %82 = math.exp %81 : vector<8x8xf32>
    %cst_41 = arith.constant dense<0.000000e+00> : vector<8xf32>
    %83 = vector.multi_reduction <add>, %82, %cst_41 [1] : vector<8x8xf32> to vector<8xf32>
    %84 = vector.shape_cast %83 : vector<8xf32> to vector<8x1xf32>
    %85 = tpu.reciprocal %84 {approx = true} : vector<8x1xf32> -> vector<8x1xf32>
    %86 = vector.broadcast %85 : vector<8x1xf32> to vector<8x8xf32>
    %87 = arith.mulf %82, %86 : vector<8x8xf32>
    %cst_42 = arith.constant dense<0.000000e+00> : vector<8x8xf32>
    %88 = tpu.matmul %87, %76, %cst_42 {dimension_numbers = #tpu.dot_dimension_numbers<[1], [0], [0], [1], [0, 0, 1, 1], [], []>} : vector<8x8xf32>, vector<8x8xf32>, vector<8x8xf32> -> vector<8x8xf32>
    %89 = vector.extract_strided_slice %7 {offsets = [24, 0], sizes = [8, 32], strides = [1, 1]} : vector<64x32xf32> to vector<8x32xf32>
    %cst_43 = arith.constant dense<0.000000e+00> : vector<8x32xf32>
    %90 = tpu.matmul %88, %89, %cst_43 {dimension_numbers = #tpu.dot_dimension_numbers<[1], [0], [0], [1], [0, 0, 1, 1], [], []>} : vector<8x8xf32>, vector<8x32xf32>, vector<8x32xf32> -> vector<8x32xf32>
    %91 = arith.addf %73, %90 : vector<8x32xf32>
    %92 = vector.extract_strided_slice %18 {offsets = [0, 96], sizes = [8, 8], strides = [1, 1]} : vector<8x192xf32> to vector<8x8xf32>
    %93 = vector.extract_strided_slice %18 {offsets = [0, 128], sizes = [8, 8], strides = [1, 1]} : vector<8x192xf32> to vector<8x8xf32>
    %94 = vector.extract_strided_slice %18 {offsets = [0, 160], sizes = [8, 8], strides = [1, 1]} : vector<8x192xf32> to vector<8x8xf32>
    %cst_44 = arith.constant dense<0.000000e+00> : vector<8x8xf32>
    %95 = tpu.matmul %92, %93, %cst_44 {dimension_numbers = #tpu.dot_dimension_numbers<[1], [1], [0], [0], [0, 0, 1, 0], [], []>} : vector<8x8xf32>, vector<8x8xf32>, vector<8x8xf32> -> vector<8x8xf32>
    %cst_45 = arith.constant dense<0xFF800000> : vector<8xf32>
    %96 = vector.multi_reduction <maximumf>, %95, %cst_45 [1] : vector<8x8xf32> to vector<8xf32>
    %97 = vector.shape_cast %96 : vector<8xf32> to vector<8x1xf32>
    %98 = vector.broadcast %97 : vector<8x1xf32> to vector<8x8xf32>
    %99 = arith.subf %95, %98 : vector<8x8xf32>
    %100 = math.exp %99 : vector<8x8xf32>
    %cst_46 = arith.constant dense<0.000000e+00> : vector<8xf32>
    %101 = vector.multi_reduction <add>, %100, %cst_46 [1] : vector<8x8xf32> to vector<8xf32>
    %102 = vector.shape_cast %101 : vector<8xf32> to vector<8x1xf32>
    %103 = tpu.reciprocal %102 {approx = true} : vector<8x1xf32> -> vector<8x1xf32>
    %104 = vector.broadcast %103 : vector<8x1xf32> to vector<8x8xf32>
    %105 = arith.mulf %100, %104 : vector<8x8xf32>
    %cst_47 = arith.constant dense<0.000000e+00> : vector<8x8xf32>
    %106 = tpu.matmul %105, %94, %cst_47 {dimension_numbers = #tpu.dot_dimension_numbers<[1], [0], [0], [1], [0, 0, 1, 1], [], []>} : vector<8x8xf32>, vector<8x8xf32>, vector<8x8xf32> -> vector<8x8xf32>
    %107 = vector.extract_strided_slice %7 {offsets = [32, 0], sizes = [8, 32], strides = [1, 1]} : vector<64x32xf32> to vector<8x32xf32>
    %cst_48 = arith.constant dense<0.000000e+00> : vector<8x32xf32>
    %108 = tpu.matmul %106, %107, %cst_48 {dimension_numbers = #tpu.dot_dimension_numbers<[1], [0], [0], [1], [0, 0, 1, 1], [], []>} : vector<8x8xf32>, vector<8x32xf32>, vector<8x32xf32> -> vector<8x32xf32>
    %109 = arith.addf %91, %108 : vector<8x32xf32>
    %110 = vector.extract_strided_slice %18 {offsets = [0, 104], sizes = [8, 8], strides = [1, 1]} : vector<8x192xf32> to vector<8x8xf32>
    %111 = vector.extract_strided_slice %18 {offsets = [0, 136], sizes = [8, 8], strides = [1, 1]} : vector<8x192xf32> to vector<8x8xf32>
    %112 = vector.extract_strided_slice %18 {offsets = [0, 168], sizes = [8, 8], strides = [1, 1]} : vector<8x192xf32> to vector<8x8xf32>
    %cst_49 = arith.constant dense<0.000000e+00> : vector<8x8xf32>
    %113 = tpu.matmul %110, %111, %cst_49 {dimension_numbers = #tpu.dot_dimension_numbers<[1], [1], [0], [0], [0, 0, 1, 0], [], []>} : vector<8x8xf32>, vector<8x8xf32>, vector<8x8xf32> -> vector<8x8xf32>
    %cst_50 = arith.constant dense<0xFF800000> : vector<8xf32>
    %114 = vector.multi_reduction <maximumf>, %113, %cst_50 [1] : vector<8x8xf32> to vector<8xf32>
    %115 = vector.shape_cast %114 : vector<8xf32> to vector<8x1xf32>
    %116 = vector.broadcast %115 : vector<8x1xf32> to vector<8x8xf32>
    %117 = arith.subf %113, %116 : vector<8x8xf32>
    %118 = math.exp %117 : vector<8x8xf32>
    %cst_51 = arith.constant dense<0.000000e+00> : vector<8xf32>
    %119 = vector.multi_reduction <add>, %118, %cst_51 [1] : vector<8x8xf32> to vector<8xf32>
    %120 = vector.shape_cast %119 : vector<8xf32> to vector<8x1xf32>
    %121 = tpu.reciprocal %120 {approx = true} : vector<8x1xf32> -> vector<8x1xf32>
    %122 = vector.broadcast %121 : vector<8x1xf32> to vector<8x8xf32>
    %123 = arith.mulf %118, %122 : vector<8x8xf32>
    %cst_52 = arith.constant dense<0.000000e+00> : vector<8x8xf32>
    %124 = tpu.matmul %123, %112, %cst_52 {dimension_numbers = #tpu.dot_dimension_numbers<[1], [0], [0], [1], [0, 0, 1, 1], [], []>} : vector<8x8xf32>, vector<8x8xf32>, vector<8x8xf32> -> vector<8x8xf32>
    %125 = vector.extract_strided_slice %7 {offsets = [40, 0], sizes = [8, 32], strides = [1, 1]} : vector<64x32xf32> to vector<8x32xf32>
    %cst_53 = arith.constant dense<0.000000e+00> : vector<8x32xf32>
    %126 = tpu.matmul %124, %125, %cst_53 {dimension_numbers = #tpu.dot_dimension_numbers<[1], [0], [0], [1], [0, 0, 1, 1], [], []>} : vector<8x8xf32>, vector<8x32xf32>, vector<8x32xf32> -> vector<8x32xf32>
    %127 = arith.addf %109, %126 : vector<8x32xf32>
    %128 = vector.extract_strided_slice %18 {offsets = [0, 112], sizes = [8, 8], strides = [1, 1]} : vector<8x192xf32> to vector<8x8xf32>
    %129 = vector.extract_strided_slice %18 {offsets = [0, 144], sizes = [8, 8], strides = [1, 1]} : vector<8x192xf32> to vector<8x8xf32>
    %130 = vector.extract_strided_slice %18 {offsets = [0, 176], sizes = [8, 8], strides = [1, 1]} : vector<8x192xf32> to vector<8x8xf32>
    %cst_54 = arith.constant dense<0.000000e+00> : vector<8x8xf32>
    %131 = tpu.matmul %128, %129, %cst_54 {dimension_numbers = #tpu.dot_dimension_numbers<[1], [1], [0], [0], [0, 0, 1, 0], [], []>} : vector<8x8xf32>, vector<8x8xf32>, vector<8x8xf32> -> vector<8x8xf32>
    %cst_55 = arith.constant dense<0xFF800000> : vector<8xf32>
    %132 = vector.multi_reduction <maximumf>, %131, %cst_55 [1] : vector<8x8xf32> to vector<8xf32>
    %133 = vector.shape_cast %132 : vector<8xf32> to vector<8x1xf32>
    %134 = vector.broadcast %133 : vector<8x1xf32> to vector<8x8xf32>
    %135 = arith.subf %131, %134 : vector<8x8xf32>
    %136 = math.exp %135 : vector<8x8xf32>
    %cst_56 = arith.constant dense<0.000000e+00> : vector<8xf32>
    %137 = vector.multi_reduction <add>, %136, %cst_56 [1] : vector<8x8xf32> to vector<8xf32>
    %138 = vector.shape_cast %137 : vector<8xf32> to vector<8x1xf32>
    %139 = tpu.reciprocal %138 {approx = true} : vector<8x1xf32> -> vector<8x1xf32>
    %140 = vector.broadcast %139 : vector<8x1xf32> to vector<8x8xf32>
    %141 = arith.mulf %136, %140 : vector<8x8xf32>
    %cst_57 = arith.constant dense<0.000000e+00> : vector<8x8xf32>
    %142 = tpu.matmul %141, %130, %cst_57 {dimension_numbers = #tpu.dot_dimension_numbers<[1], [0], [0], [1], [0, 0, 1, 1], [], []>} : vector<8x8xf32>, vector<8x8xf32>, vector<8x8xf32> -> vector<8x8xf32>
    %143 = vector.extract_strided_slice %7 {offsets = [48, 0], sizes = [8, 32], strides = [1, 1]} : vector<64x32xf32> to vector<8x32xf32>
    %cst_58 = arith.constant dense<0.000000e+00> : vector<8x32xf32>
    %144 = tpu.matmul %142, %143, %cst_58 {dimension_numbers = #tpu.dot_dimension_numbers<[1], [0], [0], [1], [0, 0, 1, 1], [], []>} : vector<8x8xf32>, vector<8x32xf32>, vector<8x32xf32> -> vector<8x32xf32>
    %145 = arith.addf %127, %144 : vector<8x32xf32>
    %146 = vector.extract_strided_slice %18 {offsets = [0, 120], sizes = [8, 8], strides = [1, 1]} : vector<8x192xf32> to vector<8x8xf32>
    %147 = vector.extract_strided_slice %18 {offsets = [0, 152], sizes = [8, 8], strides = [1, 1]} : vector<8x192xf32> to vector<8x8xf32>
    %148 = vector.extract_strided_slice %18 {offsets = [0, 184], sizes = [8, 8], strides = [1, 1]} : vector<8x192xf32> to vector<8x8xf32>
    %cst_59 = arith.constant dense<0.000000e+00> : vector<8x8xf32>
    %149 = tpu.matmul %146, %147, %cst_59 {dimension_numbers = #tpu.dot_dimension_numbers<[1], [1], [0], [0], [0, 0, 1, 0], [], []>} : vector<8x8xf32>, vector<8x8xf32>, vector<8x8xf32> -> vector<8x8xf32>
    %cst_60 = arith.constant dense<0xFF800000> : vector<8xf32>
    %150 = vector.multi_reduction <maximumf>, %149, %cst_60 [1] : vector<8x8xf32> to vector<8xf32>
    %151 = vector.shape_cast %150 : vector<8xf32> to vector<8x1xf32>
    %152 = vector.broadcast %151 : vector<8x1xf32> to vector<8x8xf32>
    %153 = arith.subf %149, %152 : vector<8x8xf32>
    %154 = math.exp %153 : vector<8x8xf32>
    %cst_61 = arith.constant dense<0.000000e+00> : vector<8xf32>
    %155 = vector.multi_reduction <add>, %154, %cst_61 [1] : vector<8x8xf32> to vector<8xf32>
    %156 = vector.shape_cast %155 : vector<8xf32> to vector<8x1xf32>
    %157 = tpu.reciprocal %156 {approx = true} : vector<8x1xf32> -> vector<8x1xf32>
    %158 = vector.broadcast %157 : vector<8x1xf32> to vector<8x8xf32>
    %159 = arith.mulf %154, %158 : vector<8x8xf32>
    %cst_62 = arith.constant dense<0.000000e+00> : vector<8x8xf32>
    %160 = tpu.matmul %159, %148, %cst_62 {dimension_numbers = #tpu.dot_dimension_numbers<[1], [0], [0], [1], [0, 0, 1, 1], [], []>} : vector<8x8xf32>, vector<8x8xf32>, vector<8x8xf32> -> vector<8x8xf32>
    %161 = vector.extract_strided_slice %7 {offsets = [56, 0], sizes = [8, 32], strides = [1, 1]} : vector<64x32xf32> to vector<8x32xf32>
    %cst_63 = arith.constant dense<0.000000e+00> : vector<8x32xf32>
    %162 = tpu.matmul %160, %161, %cst_63 {dimension_numbers = #tpu.dot_dimension_numbers<[1], [0], [0], [1], [0, 0, 1, 1], [], []>} : vector<8x8xf32>, vector<8x32xf32>, vector<8x32xf32> -> vector<8x32xf32>
    %163 = arith.addf %145, %162 : vector<8x32xf32>
    %164 = arith.addf %1, %163 : vector<8x32xf32>
    %165 = vector.extract_strided_slice %15 {offsets = [0, 0], sizes = [1, 32], strides = [1, 1]} : vector<6x32xf32> to vector<1x32xf32>
    %166 = vector.shape_cast %165 : vector<1x32xf32> to vector<32xf32>
    %167 = vector.shape_cast %166 : vector<32xf32> to vector<1x32xf32>
    %168 = vector.broadcast %167 : vector<1x32xf32> to vector<8x32xf32>
    %169 = arith.addf %164, %168 : vector<8x32xf32>
    %170 = vector.extract_strided_slice %15 {offsets = [2, 0], sizes = [1, 32], strides = [1, 1]} : vector<6x32xf32> to vector<1x32xf32>
    %171 = vector.shape_cast %170 : vector<1x32xf32> to vector<32xf32>
    %172 = vector.extract_strided_slice %15 {offsets = [3, 0], sizes = [1, 32], strides = [1, 1]} : vector<6x32xf32> to vector<1x32xf32>
    %173 = vector.shape_cast %172 : vector<1x32xf32> to vector<32xf32>
    %cst_64 = arith.constant dense<0.000000e+00> : vector<8xf32>
    %174 = vector.multi_reduction <add>, %169, %cst_64 [1] : vector<8x32xf32> to vector<8xf32>
    %175 = vector.shape_cast %174 : vector<8xf32> to vector<8x1xf32>
    %cst_65 = arith.constant 3.200000e+01 : f32
    %176 = vector.broadcast %cst_65 : f32 to vector<8x1xf32>
    %177 = arith.divf %175, %176 : vector<8x1xf32>
    %178 = vector.broadcast %177 : vector<8x1xf32> to vector<8x32xf32>
    %179 = arith.subf %169, %178 : vector<8x32xf32>
    %180 = arith.mulf %179, %179 : vector<8x32xf32>
    %cst_66 = arith.constant dense<0.000000e+00> : vector<8xf32>
    %181 = vector.multi_reduction <add>, %180, %cst_66 [1] : vector<8x32xf32> to vector<8xf32>
    %182 = vector.shape_cast %181 : vector<8xf32> to vector<8x1xf32>
    %cst_67 = arith.constant 3.200000e+01 : f32
    %183 = vector.broadcast %cst_67 : f32 to vector<8x1xf32>
    %184 = arith.divf %182, %183 : vector<8x1xf32>
    %185 = vector.broadcast %177 : vector<8x1xf32> to vector<8x32xf32>
    %186 = arith.subf %169, %185 : vector<8x32xf32>
    %cst_68 = arith.constant 9.99999974E-6 : f32
    %187 = vector.broadcast %cst_68 : f32 to vector<8x1xf32>
    %188 = arith.addf %184, %187 : vector<8x1xf32>
    %189 = math.rsqrt %188 : vector<8x1xf32>
    %190 = vector.broadcast %189 : vector<8x1xf32> to vector<8x32xf32>
    %191 = arith.mulf %186, %190 : vector<8x32xf32>
    %192 = vector.shape_cast %171 : vector<32xf32> to vector<1x32xf32>
    %193 = vector.broadcast %192 : vector<1x32xf32> to vector<8x32xf32>
    %194 = arith.mulf %191, %193 : vector<8x32xf32>
    %195 = vector.shape_cast %173 : vector<32xf32> to vector<1x32xf32>
    %196 = vector.broadcast %195 : vector<1x32xf32> to vector<8x32xf32>
    %197 = arith.addf %194, %196 : vector<8x32xf32>
    %cst_69 = arith.constant dense<0.000000e+00> : vector<8x64xf32>
    %198 = tpu.matmul %197, %9, %cst_69 {dimension_numbers = #tpu.dot_dimension_numbers<[1], [0], [0], [1], [0, 0, 1, 1], [], []>} : vector<8x32xf32>, vector<32x64xf32>, vector<8x64xf32> -> vector<8x64xf32>
    %199 = vector.broadcast %11 : vector<1x64xf32> to vector<8x64xf32>
    %200 = arith.addf %198, %199 : vector<8x64xf32>
    %cst_70 = arith.constant 0.000000e+00 : f32
    %201 = vector.broadcast %cst_70 : f32 to vector<8x64xf32>
    %202 = arith.maximumf %200, %201 : vector<8x64xf32>
    %cst_71 = arith.constant dense<0.000000e+00> : vector<8x32xf32>
    %203 = tpu.matmul %202, %13, %cst_71 {dimension_numbers = #tpu.dot_dimension_numbers<[1], [0], [0], [1], [0, 0, 1, 1], [], []>} : vector<8x64xf32>, vector<64x32xf32>, vector<8x32xf32> -> vector<8x32xf32>
    %204 = vector.extract_strided_slice %15 {offsets = [1, 0], sizes = [1, 32], strides = [1, 1]} : vector<6x32xf32> to vector<1x32xf32>
    %205 = vector.shape_cast %204 : vector<1x32xf32> to vector<32xf32>
    %206 = vector.shape_cast %205 : vector<32xf32> to vector<1x32xf32>
    %207 = vector.broadcast %206 : vector<1x32xf32> to vector<8x32xf32>
    %208 = arith.addf %203, %207 : vector<8x32xf32>
    %209 = arith.addf %197, %208 : vector<8x32xf32>
    %210 = vector.extract_strided_slice %15 {offsets = [4, 0], sizes = [1, 32], strides = [1, 1]} : vector<6x32xf32> to vector<1x32xf32>
    %211 = vector.shape_cast %210 : vector<1x32xf32> to vector<32xf32>
    %212 = vector.extract_strided_slice %15 {offsets = [5, 0], sizes = [1, 32], strides = [1, 1]} : vector<6x32xf32> to vector<1x32xf32>
    %213 = vector.shape_cast %212 : vector<1x32xf32> to vector<32xf32>
    %cst_72 = arith.constant dense<0.000000e+00> : vector<8xf32>
    %214 = vector.multi_reduction <add>, %209, %cst_72 [1] : vector<8x32xf32> to vector<8xf32>
    %215 = vector.shape_cast %214 : vector<8xf32> to vector<8x1xf32>
    %cst_73 = arith.constant 3.200000e+01 : f32
    %216 = vector.broadcast %cst_73 : f32 to vector<8x1xf32>
    %217 = arith.divf %215, %216 : vector<8x1xf32>
    %218 = vector.broadcast %217 : vector<8x1xf32> to vector<8x32xf32>
    %219 = arith.subf %209, %218 : vector<8x32xf32>
    %220 = arith.mulf %219, %219 : vector<8x32xf32>
    %cst_74 = arith.constant dense<0.000000e+00> : vector<8xf32>
    %221 = vector.multi_reduction <add>, %220, %cst_74 [1] : vector<8x32xf32> to vector<8xf32>
    %222 = vector.shape_cast %221 : vector<8xf32> to vector<8x1xf32>
    %cst_75 = arith.constant 3.200000e+01 : f32
    %223 = vector.broadcast %cst_75 : f32 to vector<8x1xf32>
    %224 = arith.divf %222, %223 : vector<8x1xf32>
    %225 = vector.broadcast %217 : vector<8x1xf32> to vector<8x32xf32>
    %226 = arith.subf %209, %225 : vector<8x32xf32>
    %cst_76 = arith.constant 9.99999974E-6 : f32
    %227 = vector.broadcast %cst_76 : f32 to vector<8x1xf32>
    %228 = arith.addf %224, %227 : vector<8x1xf32>
    %229 = math.rsqrt %228 : vector<8x1xf32>
    %230 = vector.broadcast %229 : vector<8x1xf32> to vector<8x32xf32>
    %231 = arith.mulf %226, %230 : vector<8x32xf32>
    %232 = vector.shape_cast %211 : vector<32xf32> to vector<1x32xf32>
    %233 = vector.broadcast %232 : vector<1x32xf32> to vector<8x32xf32>
    %234 = arith.mulf %231, %233 : vector<8x32xf32>
    %235 = vector.shape_cast %213 : vector<32xf32> to vector<1x32xf32>
    %236 = vector.broadcast %235 : vector<1x32xf32> to vector<8x32xf32>
    %237 = arith.addf %234, %236 : vector<8x32xf32>
    %c1 = arith.constant 1 : index
    %c0_77 = arith.constant 0 : index
    %c0_78 = arith.constant 0 : index
    %238 = vector.load %arg2[%c1, %c0_77, %c0_78] : memref<2x32x192xf32, #tpu.memory_space<vmem>>, vector<1x32x192xf32>
    %239 = vector.shape_cast %238 : vector<1x32x192xf32> to vector<32x192xf32>
    %c1_79 = arith.constant 1 : index
    %c0_80 = arith.constant 0 : index
    %c0_81 = arith.constant 0 : index
    %240 = vector.load %arg3[%c1_79, %c0_80, %c0_81] : memref<2x1x192xf32, #tpu.memory_space<vmem>>, vector<1x1x192xf32>
    %241 = vector.shape_cast %240 : vector<1x1x192xf32> to vector<1x192xf32>
    %c1_82 = arith.constant 1 : index
    %c0_83 = arith.constant 0 : index
    %c0_84 = arith.constant 0 : index
    %242 = vector.load %arg4[%c1_82, %c0_83, %c0_84] : memref<2x64x32xf32, #tpu.memory_space<vmem>>, vector<1x64x32xf32>
    %243 = vector.shape_cast %242 : vector<1x64x32xf32> to vector<64x32xf32>
    %c1_85 = arith.constant 1 : index
    %c0_86 = arith.constant 0 : index
    %c0_87 = arith.constant 0 : index
    %244 = vector.load %arg5[%c1_85, %c0_86, %c0_87] : memref<2x32x64xf32, #tpu.memory_space<vmem>>, vector<1x32x64xf32>
    %245 = vector.shape_cast %244 : vector<1x32x64xf32> to vector<32x64xf32>
    %c1_88 = arith.constant 1 : index
    %c0_89 = arith.constant 0 : index
    %c0_90 = arith.constant 0 : index
    %246 = vector.load %arg6[%c1_88, %c0_89, %c0_90] : memref<2x1x64xf32, #tpu.memory_space<vmem>>, vector<1x1x64xf32>
    %247 = vector.shape_cast %246 : vector<1x1x64xf32> to vector<1x64xf32>
    %c1_91 = arith.constant 1 : index
    %c0_92 = arith.constant 0 : index
    %c0_93 = arith.constant 0 : index
    %248 = vector.load %arg7[%c1_91, %c0_92, %c0_93] : memref<2x64x32xf32, #tpu.memory_space<vmem>>, vector<1x64x32xf32>
    %249 = vector.shape_cast %248 : vector<1x64x32xf32> to vector<64x32xf32>
    %c1_94 = arith.constant 1 : index
    %c0_95 = arith.constant 0 : index
    %c0_96 = arith.constant 0 : index
    %250 = vector.load %arg8[%c1_94, %c0_95, %c0_96] : memref<2x6x32xf32, #tpu.memory_space<vmem>>, vector<1x6x32xf32>
    %251 = vector.shape_cast %250 : vector<1x6x32xf32> to vector<6x32xf32>
    %cst_97 = arith.constant dense<0.000000e+00> : vector<8x192xf32>
    %252 = tpu.matmul %237, %239, %cst_97 {dimension_numbers = #tpu.dot_dimension_numbers<[1], [0], [0], [1], [0, 0, 1, 1], [], []>} : vector<8x32xf32>, vector<32x192xf32>, vector<8x192xf32> -> vector<8x192xf32>
    %253 = vector.broadcast %241 : vector<1x192xf32> to vector<8x192xf32>
    %254 = arith.addf %252, %253 : vector<8x192xf32>
    %cst_98 = arith.constant 0.000000e+00 : f32
    %255 = vector.broadcast %cst_98 : f32 to vector<8x32xf32>
    %256 = vector.extract_strided_slice %254 {offsets = [0, 0], sizes = [8, 8], strides = [1, 1]} : vector<8x192xf32> to vector<8x8xf32>
    %257 = vector.extract_strided_slice %254 {offsets = [0, 32], sizes = [8, 8], strides = [1, 1]} : vector<8x192xf32> to vector<8x8xf32>
    %258 = vector.extract_strided_slice %254 {offsets = [0, 64], sizes = [8, 8], strides = [1, 1]} : vector<8x192xf32> to vector<8x8xf32>
    %cst_99 = arith.constant dense<0.000000e+00> : vector<8x8xf32>
    %259 = tpu.matmul %256, %257, %cst_99 {dimension_numbers = #tpu.dot_dimension_numbers<[1], [1], [0], [0], [0, 0, 1, 0], [], []>} : vector<8x8xf32>, vector<8x8xf32>, vector<8x8xf32> -> vector<8x8xf32>
    %cst_100 = arith.constant dense<0xFF800000> : vector<8xf32>
    %260 = vector.multi_reduction <maximumf>, %259, %cst_100 [1] : vector<8x8xf32> to vector<8xf32>
    %261 = vector.shape_cast %260 : vector<8xf32> to vector<8x1xf32>
    %262 = vector.broadcast %261 : vector<8x1xf32> to vector<8x8xf32>
    %263 = arith.subf %259, %262 : vector<8x8xf32>
    %264 = math.exp %263 : vector<8x8xf32>
    %cst_101 = arith.constant dense<0.000000e+00> : vector<8xf32>
    %265 = vector.multi_reduction <add>, %264, %cst_101 [1] : vector<8x8xf32> to vector<8xf32>
    %266 = vector.shape_cast %265 : vector<8xf32> to vector<8x1xf32>
    %267 = tpu.reciprocal %266 {approx = true} : vector<8x1xf32> -> vector<8x1xf32>
    %268 = vector.broadcast %267 : vector<8x1xf32> to vector<8x8xf32>
    %269 = arith.mulf %264, %268 : vector<8x8xf32>
    %cst_102 = arith.constant dense<0.000000e+00> : vector<8x8xf32>
    %270 = tpu.matmul %269, %258, %cst_102 {dimension_numbers = #tpu.dot_dimension_numbers<[1], [0], [0], [1], [0, 0, 1, 1], [], []>} : vector<8x8xf32>, vector<8x8xf32>, vector<8x8xf32> -> vector<8x8xf32>
    %271 = vector.extract_strided_slice %243 {offsets = [0, 0], sizes = [8, 32], strides = [1, 1]} : vector<64x32xf32> to vector<8x32xf32>
    %cst_103 = arith.constant dense<0.000000e+00> : vector<8x32xf32>
    %272 = tpu.matmul %270, %271, %cst_103 {dimension_numbers = #tpu.dot_dimension_numbers<[1], [0], [0], [1], [0, 0, 1, 1], [], []>} : vector<8x8xf32>, vector<8x32xf32>, vector<8x32xf32> -> vector<8x32xf32>
    %273 = arith.addf %255, %272 : vector<8x32xf32>
    %274 = vector.extract_strided_slice %254 {offsets = [0, 8], sizes = [8, 8], strides = [1, 1]} : vector<8x192xf32> to vector<8x8xf32>
    %275 = vector.extract_strided_slice %254 {offsets = [0, 40], sizes = [8, 8], strides = [1, 1]} : vector<8x192xf32> to vector<8x8xf32>
    %276 = vector.extract_strided_slice %254 {offsets = [0, 72], sizes = [8, 8], strides = [1, 1]} : vector<8x192xf32> to vector<8x8xf32>
    %cst_104 = arith.constant dense<0.000000e+00> : vector<8x8xf32>
    %277 = tpu.matmul %274, %275, %cst_104 {dimension_numbers = #tpu.dot_dimension_numbers<[1], [1], [0], [0], [0, 0, 1, 0], [], []>} : vector<8x8xf32>, vector<8x8xf32>, vector<8x8xf32> -> vector<8x8xf32>
    %cst_105 = arith.constant dense<0xFF800000> : vector<8xf32>
    %278 = vector.multi_reduction <maximumf>, %277, %cst_105 [1] : vector<8x8xf32> to vector<8xf32>
    %279 = vector.shape_cast %278 : vector<8xf32> to vector<8x1xf32>
    %280 = vector.broadcast %279 : vector<8x1xf32> to vector<8x8xf32>
    %281 = arith.subf %277, %280 : vector<8x8xf32>
    %282 = math.exp %281 : vector<8x8xf32>
    %cst_106 = arith.constant dense<0.000000e+00> : vector<8xf32>
    %283 = vector.multi_reduction <add>, %282, %cst_106 [1] : vector<8x8xf32> to vector<8xf32>
    %284 = vector.shape_cast %283 : vector<8xf32> to vector<8x1xf32>
    %285 = tpu.reciprocal %284 {approx = true} : vector<8x1xf32> -> vector<8x1xf32>
    %286 = vector.broadcast %285 : vector<8x1xf32> to vector<8x8xf32>
    %287 = arith.mulf %282, %286 : vector<8x8xf32>
    %cst_107 = arith.constant dense<0.000000e+00> : vector<8x8xf32>
    %288 = tpu.matmul %287, %276, %cst_107 {dimension_numbers = #tpu.dot_dimension_numbers<[1], [0], [0], [1], [0, 0, 1, 1], [], []>} : vector<8x8xf32>, vector<8x8xf32>, vector<8x8xf32> -> vector<8x8xf32>
    %289 = vector.extract_strided_slice %243 {offsets = [8, 0], sizes = [8, 32], strides = [1, 1]} : vector<64x32xf32> to vector<8x32xf32>
    %cst_108 = arith.constant dense<0.000000e+00> : vector<8x32xf32>
    %290 = tpu.matmul %288, %289, %cst_108 {dimension_numbers = #tpu.dot_dimension_numbers<[1], [0], [0], [1], [0, 0, 1, 1], [], []>} : vector<8x8xf32>, vector<8x32xf32>, vector<8x32xf32> -> vector<8x32xf32>
    %291 = arith.addf %273, %290 : vector<8x32xf32>
    %292 = vector.extract_strided_slice %254 {offsets = [0, 16], sizes = [8, 8], strides = [1, 1]} : vector<8x192xf32> to vector<8x8xf32>
    %293 = vector.extract_strided_slice %254 {offsets = [0, 48], sizes = [8, 8], strides = [1, 1]} : vector<8x192xf32> to vector<8x8xf32>
    %294 = vector.extract_strided_slice %254 {offsets = [0, 80], sizes = [8, 8], strides = [1, 1]} : vector<8x192xf32> to vector<8x8xf32>
    %cst_109 = arith.constant dense<0.000000e+00> : vector<8x8xf32>
    %295 = tpu.matmul %292, %293, %cst_109 {dimension_numbers = #tpu.dot_dimension_numbers<[1], [1], [0], [0], [0, 0, 1, 0], [], []>} : vector<8x8xf32>, vector<8x8xf32>, vector<8x8xf32> -> vector<8x8xf32>
    %cst_110 = arith.constant dense<0xFF800000> : vector<8xf32>
    %296 = vector.multi_reduction <maximumf>, %295, %cst_110 [1] : vector<8x8xf32> to vector<8xf32>
    %297 = vector.shape_cast %296 : vector<8xf32> to vector<8x1xf32>
    %298 = vector.broadcast %297 : vector<8x1xf32> to vector<8x8xf32>
    %299 = arith.subf %295, %298 : vector<8x8xf32>
    %300 = math.exp %299 : vector<8x8xf32>
    %cst_111 = arith.constant dense<0.000000e+00> : vector<8xf32>
    %301 = vector.multi_reduction <add>, %300, %cst_111 [1] : vector<8x8xf32> to vector<8xf32>
    %302 = vector.shape_cast %301 : vector<8xf32> to vector<8x1xf32>
    %303 = tpu.reciprocal %302 {approx = true} : vector<8x1xf32> -> vector<8x1xf32>
    %304 = vector.broadcast %303 : vector<8x1xf32> to vector<8x8xf32>
    %305 = arith.mulf %300, %304 : vector<8x8xf32>
    %cst_112 = arith.constant dense<0.000000e+00> : vector<8x8xf32>
    %306 = tpu.matmul %305, %294, %cst_112 {dimension_numbers = #tpu.dot_dimension_numbers<[1], [0], [0], [1], [0, 0, 1, 1], [], []>} : vector<8x8xf32>, vector<8x8xf32>, vector<8x8xf32> -> vector<8x8xf32>
    %307 = vector.extract_strided_slice %243 {offsets = [16, 0], sizes = [8, 32], strides = [1, 1]} : vector<64x32xf32> to vector<8x32xf32>
    %cst_113 = arith.constant dense<0.000000e+00> : vector<8x32xf32>
    %308 = tpu.matmul %306, %307, %cst_113 {dimension_numbers = #tpu.dot_dimension_numbers<[1], [0], [0], [1], [0, 0, 1, 1], [], []>} : vector<8x8xf32>, vector<8x32xf32>, vector<8x32xf32> -> vector<8x32xf32>
    %309 = arith.addf %291, %308 : vector<8x32xf32>
    %310 = vector.extract_strided_slice %254 {offsets = [0, 24], sizes = [8, 8], strides = [1, 1]} : vector<8x192xf32> to vector<8x8xf32>
    %311 = vector.extract_strided_slice %254 {offsets = [0, 56], sizes = [8, 8], strides = [1, 1]} : vector<8x192xf32> to vector<8x8xf32>
    %312 = vector.extract_strided_slice %254 {offsets = [0, 88], sizes = [8, 8], strides = [1, 1]} : vector<8x192xf32> to vector<8x8xf32>
    %cst_114 = arith.constant dense<0.000000e+00> : vector<8x8xf32>
    %313 = tpu.matmul %310, %311, %cst_114 {dimension_numbers = #tpu.dot_dimension_numbers<[1], [1], [0], [0], [0, 0, 1, 0], [], []>} : vector<8x8xf32>, vector<8x8xf32>, vector<8x8xf32> -> vector<8x8xf32>
    %cst_115 = arith.constant dense<0xFF800000> : vector<8xf32>
    %314 = vector.multi_reduction <maximumf>, %313, %cst_115 [1] : vector<8x8xf32> to vector<8xf32>
    %315 = vector.shape_cast %314 : vector<8xf32> to vector<8x1xf32>
    %316 = vector.broadcast %315 : vector<8x1xf32> to vector<8x8xf32>
    %317 = arith.subf %313, %316 : vector<8x8xf32>
    %318 = math.exp %317 : vector<8x8xf32>
    %cst_116 = arith.constant dense<0.000000e+00> : vector<8xf32>
    %319 = vector.multi_reduction <add>, %318, %cst_116 [1] : vector<8x8xf32> to vector<8xf32>
    %320 = vector.shape_cast %319 : vector<8xf32> to vector<8x1xf32>
    %321 = tpu.reciprocal %320 {approx = true} : vector<8x1xf32> -> vector<8x1xf32>
    %322 = vector.broadcast %321 : vector<8x1xf32> to vector<8x8xf32>
    %323 = arith.mulf %318, %322 : vector<8x8xf32>
    %cst_117 = arith.constant dense<0.000000e+00> : vector<8x8xf32>
    %324 = tpu.matmul %323, %312, %cst_117 {dimension_numbers = #tpu.dot_dimension_numbers<[1], [0], [0], [1], [0, 0, 1, 1], [], []>} : vector<8x8xf32>, vector<8x8xf32>, vector<8x8xf32> -> vector<8x8xf32>
    %325 = vector.extract_strided_slice %243 {offsets = [24, 0], sizes = [8, 32], strides = [1, 1]} : vector<64x32xf32> to vector<8x32xf32>
    %cst_118 = arith.constant dense<0.000000e+00> : vector<8x32xf32>
    %326 = tpu.matmul %324, %325, %cst_118 {dimension_numbers = #tpu.dot_dimension_numbers<[1], [0], [0], [1], [0, 0, 1, 1], [], []>} : vector<8x8xf32>, vector<8x32xf32>, vector<8x32xf32> -> vector<8x32xf32>
    %327 = arith.addf %309, %326 : vector<8x32xf32>
    %328 = vector.extract_strided_slice %254 {offsets = [0, 96], sizes = [8, 8], strides = [1, 1]} : vector<8x192xf32> to vector<8x8xf32>
    %329 = vector.extract_strided_slice %254 {offsets = [0, 128], sizes = [8, 8], strides = [1, 1]} : vector<8x192xf32> to vector<8x8xf32>
    %330 = vector.extract_strided_slice %254 {offsets = [0, 160], sizes = [8, 8], strides = [1, 1]} : vector<8x192xf32> to vector<8x8xf32>
    %cst_119 = arith.constant dense<0.000000e+00> : vector<8x8xf32>
    %331 = tpu.matmul %328, %329, %cst_119 {dimension_numbers = #tpu.dot_dimension_numbers<[1], [1], [0], [0], [0, 0, 1, 0], [], []>} : vector<8x8xf32>, vector<8x8xf32>, vector<8x8xf32> -> vector<8x8xf32>
    %cst_120 = arith.constant dense<0xFF800000> : vector<8xf32>
    %332 = vector.multi_reduction <maximumf>, %331, %cst_120 [1] : vector<8x8xf32> to vector<8xf32>
    %333 = vector.shape_cast %332 : vector<8xf32> to vector<8x1xf32>
    %334 = vector.broadcast %333 : vector<8x1xf32> to vector<8x8xf32>
    %335 = arith.subf %331, %334 : vector<8x8xf32>
    %336 = math.exp %335 : vector<8x8xf32>
    %cst_121 = arith.constant dense<0.000000e+00> : vector<8xf32>
    %337 = vector.multi_reduction <add>, %336, %cst_121 [1] : vector<8x8xf32> to vector<8xf32>
    %338 = vector.shape_cast %337 : vector<8xf32> to vector<8x1xf32>
    %339 = tpu.reciprocal %338 {approx = true} : vector<8x1xf32> -> vector<8x1xf32>
    %340 = vector.broadcast %339 : vector<8x1xf32> to vector<8x8xf32>
    %341 = arith.mulf %336, %340 : vector<8x8xf32>
    %cst_122 = arith.constant dense<0.000000e+00> : vector<8x8xf32>
    %342 = tpu.matmul %341, %330, %cst_122 {dimension_numbers = #tpu.dot_dimension_numbers<[1], [0], [0], [1], [0, 0, 1, 1], [], []>} : vector<8x8xf32>, vector<8x8xf32>, vector<8x8xf32> -> vector<8x8xf32>
    %343 = vector.extract_strided_slice %243 {offsets = [32, 0], sizes = [8, 32], strides = [1, 1]} : vector<64x32xf32> to vector<8x32xf32>
    %cst_123 = arith.constant dense<0.000000e+00> : vector<8x32xf32>
    %344 = tpu.matmul %342, %343, %cst_123 {dimension_numbers = #tpu.dot_dimension_numbers<[1], [0], [0], [1], [0, 0, 1, 1], [], []>} : vector<8x8xf32>, vector<8x32xf32>, vector<8x32xf32> -> vector<8x32xf32>
    %345 = arith.addf %327, %344 : vector<8x32xf32>
    %346 = vector.extract_strided_slice %254 {offsets = [0, 104], sizes = [8, 8], strides = [1, 1]} : vector<8x192xf32> to vector<8x8xf32>
    %347 = vector.extract_strided_slice %254 {offsets = [0, 136], sizes = [8, 8], strides = [1, 1]} : vector<8x192xf32> to vector<8x8xf32>
    %348 = vector.extract_strided_slice %254 {offsets = [0, 168], sizes = [8, 8], strides = [1, 1]} : vector<8x192xf32> to vector<8x8xf32>
    %cst_124 = arith.constant dense<0.000000e+00> : vector<8x8xf32>
    %349 = tpu.matmul %346, %347, %cst_124 {dimension_numbers = #tpu.dot_dimension_numbers<[1], [1], [0], [0], [0, 0, 1, 0], [], []>} : vector<8x8xf32>, vector<8x8xf32>, vector<8x8xf32> -> vector<8x8xf32>
    %cst_125 = arith.constant dense<0xFF800000> : vector<8xf32>
    %350 = vector.multi_reduction <maximumf>, %349, %cst_125 [1] : vector<8x8xf32> to vector<8xf32>
    %351 = vector.shape_cast %350 : vector<8xf32> to vector<8x1xf32>
    %352 = vector.broadcast %351 : vector<8x1xf32> to vector<8x8xf32>
    %353 = arith.subf %349, %352 : vector<8x8xf32>
    %354 = math.exp %353 : vector<8x8xf32>
    %cst_126 = arith.constant dense<0.000000e+00> : vector<8xf32>
    %355 = vector.multi_reduction <add>, %354, %cst_126 [1] : vector<8x8xf32> to vector<8xf32>
    %356 = vector.shape_cast %355 : vector<8xf32> to vector<8x1xf32>
    %357 = tpu.reciprocal %356 {approx = true} : vector<8x1xf32> -> vector<8x1xf32>
    %358 = vector.broadcast %357 : vector<8x1xf32> to vector<8x8xf32>
    %359 = arith.mulf %354, %358 : vector<8x8xf32>
    %cst_127 = arith.constant dense<0.000000e+00> : vector<8x8xf32>
    %360 = tpu.matmul %359, %348, %cst_127 {dimension_numbers = #tpu.dot_dimension_numbers<[1], [0], [0], [1], [0, 0, 1, 1], [], []>} : vector<8x8xf32>, vector<8x8xf32>, vector<8x8xf32> -> vector<8x8xf32>
    %361 = vector.extract_strided_slice %243 {offsets = [40, 0], sizes = [8, 32], strides = [1, 1]} : vector<64x32xf32> to vector<8x32xf32>
    %cst_128 = arith.constant dense<0.000000e+00> : vector<8x32xf32>
    %362 = tpu.matmul %360, %361, %cst_128 {dimension_numbers = #tpu.dot_dimension_numbers<[1], [0], [0], [1], [0, 0, 1, 1], [], []>} : vector<8x8xf32>, vector<8x32xf32>, vector<8x32xf32> -> vector<8x32xf32>
    %363 = arith.addf %345, %362 : vector<8x32xf32>
    %364 = vector.extract_strided_slice %254 {offsets = [0, 112], sizes = [8, 8], strides = [1, 1]} : vector<8x192xf32> to vector<8x8xf32>
    %365 = vector.extract_strided_slice %254 {offsets = [0, 144], sizes = [8, 8], strides = [1, 1]} : vector<8x192xf32> to vector<8x8xf32>
    %366 = vector.extract_strided_slice %254 {offsets = [0, 176], sizes = [8, 8], strides = [1, 1]} : vector<8x192xf32> to vector<8x8xf32>
    %cst_129 = arith.constant dense<0.000000e+00> : vector<8x8xf32>
    %367 = tpu.matmul %364, %365, %cst_129 {dimension_numbers = #tpu.dot_dimension_numbers<[1], [1], [0], [0], [0, 0, 1, 0], [], []>} : vector<8x8xf32>, vector<8x8xf32>, vector<8x8xf32> -> vector<8x8xf32>
    %cst_130 = arith.constant dense<0xFF800000> : vector<8xf32>
    %368 = vector.multi_reduction <maximumf>, %367, %cst_130 [1] : vector<8x8xf32> to vector<8xf32>
    %369 = vector.shape_cast %368 : vector<8xf32> to vector<8x1xf32>
    %370 = vector.broadcast %369 : vector<8x1xf32> to vector<8x8xf32>
    %371 = arith.subf %367, %370 : vector<8x8xf32>
    %372 = math.exp %371 : vector<8x8xf32>
    %cst_131 = arith.constant dense<0.000000e+00> : vector<8xf32>
    %373 = vector.multi_reduction <add>, %372, %cst_131 [1] : vector<8x8xf32> to vector<8xf32>
    %374 = vector.shape_cast %373 : vector<8xf32> to vector<8x1xf32>
    %375 = tpu.reciprocal %374 {approx = true} : vector<8x1xf32> -> vector<8x1xf32>
    %376 = vector.broadcast %375 : vector<8x1xf32> to vector<8x8xf32>
    %377 = arith.mulf %372, %376 : vector<8x8xf32>
    %cst_132 = arith.constant dense<0.000000e+00> : vector<8x8xf32>
    %378 = tpu.matmul %377, %366, %cst_132 {dimension_numbers = #tpu.dot_dimension_numbers<[1], [0], [0], [1], [0, 0, 1, 1], [], []>} : vector<8x8xf32>, vector<8x8xf32>, vector<8x8xf32> -> vector<8x8xf32>
    %379 = vector.extract_strided_slice %243 {offsets = [48, 0], sizes = [8, 32], strides = [1, 1]} : vector<64x32xf32> to vector<8x32xf32>
    %cst_133 = arith.constant dense<0.000000e+00> : vector<8x32xf32>
    %380 = tpu.matmul %378, %379, %cst_133 {dimension_numbers = #tpu.dot_dimension_numbers<[1], [0], [0], [1], [0, 0, 1, 1], [], []>} : vector<8x8xf32>, vector<8x32xf32>, vector<8x32xf32> -> vector<8x32xf32>
    %381 = arith.addf %363, %380 : vector<8x32xf32>
    %382 = vector.extract_strided_slice %254 {offsets = [0, 120], sizes = [8, 8], strides = [1, 1]} : vector<8x192xf32> to vector<8x8xf32>
    %383 = vector.extract_strided_slice %254 {offsets = [0, 152], sizes = [8, 8], strides = [1, 1]} : vector<8x192xf32> to vector<8x8xf32>
    %384 = vector.extract_strided_slice %254 {offsets = [0, 184], sizes = [8, 8], strides = [1, 1]} : vector<8x192xf32> to vector<8x8xf32>
    %cst_134 = arith.constant dense<0.000000e+00> : vector<8x8xf32>
    %385 = tpu.matmul %382, %383, %cst_134 {dimension_numbers = #tpu.dot_dimension_numbers<[1], [1], [0], [0], [0, 0, 1, 0], [], []>} : vector<8x8xf32>, vector<8x8xf32>, vector<8x8xf32> -> vector<8x8xf32>
    %cst_135 = arith.constant dense<0xFF800000> : vector<8xf32>
    %386 = vector.multi_reduction <maximumf>, %385, %cst_135 [1] : vector<8x8xf32> to vector<8xf32>
    %387 = vector.shape_cast %386 : vector<8xf32> to vector<8x1xf32>
    %388 = vector.broadcast %387 : vector<8x1xf32> to vector<8x8xf32>
    %389 = arith.subf %385, %388 : vector<8x8xf32>
    %390 = math.exp %389 : vector<8x8xf32>
    %cst_136 = arith.constant dense<0.000000e+00> : vector<8xf32>
    %391 = vector.multi_reduction <add>, %390, %cst_136 [1] : vector<8x8xf32> to vector<8xf32>
    %392 = vector.shape_cast %391 : vector<8xf32> to vector<8x1xf32>
    %393 = tpu.reciprocal %392 {approx = true} : vector<8x1xf32> -> vector<8x1xf32>
    %394 = vector.broadcast %393 : vector<8x1xf32> to vector<8x8xf32>
    %395 = arith.mulf %390, %394 : vector<8x8xf32>
    %cst_137 = arith.constant dense<0.000000e+00> : vector<8x8xf32>
    %396 = tpu.matmul %395, %384, %cst_137 {dimension_numbers = #tpu.dot_dimension_numbers<[1], [0], [0], [1], [0, 0, 1, 1], [], []>} : vector<8x8xf32>, vector<8x8xf32>, vector<8x8xf32> -> vector<8x8xf32>
    %397 = vector.extract_strided_slice %243 {offsets = [56, 0], sizes = [8, 32], strides = [1, 1]} : vector<64x32xf32> to vector<8x32xf32>
    %cst_138 = arith.constant dense<0.000000e+00> : vector<8x32xf32>
    %398 = tpu.matmul %396, %397, %cst_138 {dimension_numbers = #tpu.dot_dimension_numbers<[1], [0], [0], [1], [0, 0, 1, 1], [], []>} : vector<8x8xf32>, vector<8x32xf32>, vector<8x32xf32> -> vector<8x32xf32>
    %399 = arith.addf %381, %398 : vector<8x32xf32>
    %400 = arith.addf %237, %399 : vector<8x32xf32>
    %401 = vector.extract_strided_slice %251 {offsets = [0, 0], sizes = [1, 32], strides = [1, 1]} : vector<6x32xf32> to vector<1x32xf32>
    %402 = vector.shape_cast %401 : vector<1x32xf32> to vector<32xf32>
    %403 = vector.shape_cast %402 : vector<32xf32> to vector<1x32xf32>
    %404 = vector.broadcast %403 : vector<1x32xf32> to vector<8x32xf32>
    %405 = arith.addf %400, %404 : vector<8x32xf32>
    %406 = vector.extract_strided_slice %251 {offsets = [2, 0], sizes = [1, 32], strides = [1, 1]} : vector<6x32xf32> to vector<1x32xf32>
    %407 = vector.shape_cast %406 : vector<1x32xf32> to vector<32xf32>
    %408 = vector.extract_strided_slice %251 {offsets = [3, 0], sizes = [1, 32], strides = [1, 1]} : vector<6x32xf32> to vector<1x32xf32>
    %409 = vector.shape_cast %408 : vector<1x32xf32> to vector<32xf32>
    %cst_139 = arith.constant dense<0.000000e+00> : vector<8xf32>
    %410 = vector.multi_reduction <add>, %405, %cst_139 [1] : vector<8x32xf32> to vector<8xf32>
    %411 = vector.shape_cast %410 : vector<8xf32> to vector<8x1xf32>
    %cst_140 = arith.constant 3.200000e+01 : f32
    %412 = vector.broadcast %cst_140 : f32 to vector<8x1xf32>
    %413 = arith.divf %411, %412 : vector<8x1xf32>
    %414 = vector.broadcast %413 : vector<8x1xf32> to vector<8x32xf32>
    %415 = arith.subf %405, %414 : vector<8x32xf32>
    %416 = arith.mulf %415, %415 : vector<8x32xf32>
    %cst_141 = arith.constant dense<0.000000e+00> : vector<8xf32>
    %417 = vector.multi_reduction <add>, %416, %cst_141 [1] : vector<8x32xf32> to vector<8xf32>
    %418 = vector.shape_cast %417 : vector<8xf32> to vector<8x1xf32>
    %cst_142 = arith.constant 3.200000e+01 : f32
    %419 = vector.broadcast %cst_142 : f32 to vector<8x1xf32>
    %420 = arith.divf %418, %419 : vector<8x1xf32>
    %421 = vector.broadcast %413 : vector<8x1xf32> to vector<8x32xf32>
    %422 = arith.subf %405, %421 : vector<8x32xf32>
    %cst_143 = arith.constant 9.99999974E-6 : f32
    %423 = vector.broadcast %cst_143 : f32 to vector<8x1xf32>
    %424 = arith.addf %420, %423 : vector<8x1xf32>
    %425 = math.rsqrt %424 : vector<8x1xf32>
    %426 = vector.broadcast %425 : vector<8x1xf32> to vector<8x32xf32>
    %427 = arith.mulf %422, %426 : vector<8x32xf32>
    %428 = vector.shape_cast %407 : vector<32xf32> to vector<1x32xf32>
    %429 = vector.broadcast %428 : vector<1x32xf32> to vector<8x32xf32>
    %430 = arith.mulf %427, %429 : vector<8x32xf32>
    %431 = vector.shape_cast %409 : vector<32xf32> to vector<1x32xf32>
    %432 = vector.broadcast %431 : vector<1x32xf32> to vector<8x32xf32>
    %433 = arith.addf %430, %432 : vector<8x32xf32>
    %cst_144 = arith.constant dense<0.000000e+00> : vector<8x64xf32>
    %434 = tpu.matmul %433, %245, %cst_144 {dimension_numbers = #tpu.dot_dimension_numbers<[1], [0], [0], [1], [0, 0, 1, 1], [], []>} : vector<8x32xf32>, vector<32x64xf32>, vector<8x64xf32> -> vector<8x64xf32>
    %435 = vector.broadcast %247 : vector<1x64xf32> to vector<8x64xf32>
    %436 = arith.addf %434, %435 : vector<8x64xf32>
    %cst_145 = arith.constant 0.000000e+00 : f32
    %437 = vector.broadcast %cst_145 : f32 to vector<8x64xf32>
    %438 = arith.maximumf %436, %437 : vector<8x64xf32>
    %cst_146 = arith.constant dense<0.000000e+00> : vector<8x32xf32>
    %439 = tpu.matmul %438, %249, %cst_146 {dimension_numbers = #tpu.dot_dimension_numbers<[1], [0], [0], [1], [0, 0, 1, 1], [], []>} : vector<8x64xf32>, vector<64x32xf32>, vector<8x32xf32> -> vector<8x32xf32>
    %440 = vector.extract_strided_slice %251 {offsets = [1, 0], sizes = [1, 32], strides = [1, 1]} : vector<6x32xf32> to vector<1x32xf32>
    %441 = vector.shape_cast %440 : vector<1x32xf32> to vector<32xf32>
    %442 = vector.shape_cast %441 : vector<32xf32> to vector<1x32xf32>
    %443 = vector.broadcast %442 : vector<1x32xf32> to vector<8x32xf32>
    %444 = arith.addf %439, %443 : vector<8x32xf32>
    %445 = arith.addf %433, %444 : vector<8x32xf32>
    %446 = vector.extract_strided_slice %251 {offsets = [4, 0], sizes = [1, 32], strides = [1, 1]} : vector<6x32xf32> to vector<1x32xf32>
    %447 = vector.shape_cast %446 : vector<1x32xf32> to vector<32xf32>
    %448 = vector.extract_strided_slice %251 {offsets = [5, 0], sizes = [1, 32], strides = [1, 1]} : vector<6x32xf32> to vector<1x32xf32>
    %449 = vector.shape_cast %448 : vector<1x32xf32> to vector<32xf32>
    %cst_147 = arith.constant dense<0.000000e+00> : vector<8xf32>
    %450 = vector.multi_reduction <add>, %445, %cst_147 [1] : vector<8x32xf32> to vector<8xf32>
    %451 = vector.shape_cast %450 : vector<8xf32> to vector<8x1xf32>
    %cst_148 = arith.constant 3.200000e+01 : f32
    %452 = vector.broadcast %cst_148 : f32 to vector<8x1xf32>
    %453 = arith.divf %451, %452 : vector<8x1xf32>
    %454 = vector.broadcast %453 : vector<8x1xf32> to vector<8x32xf32>
    %455 = arith.subf %445, %454 : vector<8x32xf32>
    %456 = arith.mulf %455, %455 : vector<8x32xf32>
    %cst_149 = arith.constant dense<0.000000e+00> : vector<8xf32>
    %457 = vector.multi_reduction <add>, %456, %cst_149 [1] : vector<8x32xf32> to vector<8xf32>
    %458 = vector.shape_cast %457 : vector<8xf32> to vector<8x1xf32>
    %cst_150 = arith.constant 3.200000e+01 : f32
    %459 = vector.broadcast %cst_150 : f32 to vector<8x1xf32>
    %460 = arith.divf %458, %459 : vector<8x1xf32>
    %461 = vector.broadcast %453 : vector<8x1xf32> to vector<8x32xf32>
    %462 = arith.subf %445, %461 : vector<8x32xf32>
    %cst_151 = arith.constant 9.99999974E-6 : f32
    %463 = vector.broadcast %cst_151 : f32 to vector<8x1xf32>
    %464 = arith.addf %460, %463 : vector<8x1xf32>
    %465 = math.rsqrt %464 : vector<8x1xf32>
    %466 = vector.broadcast %465 : vector<8x1xf32> to vector<8x32xf32>
    %467 = arith.mulf %462, %466 : vector<8x32xf32>
    %468 = vector.shape_cast %447 : vector<32xf32> to vector<1x32xf32>
    %469 = vector.broadcast %468 : vector<1x32xf32> to vector<8x32xf32>
    %470 = arith.mulf %467, %469 : vector<8x32xf32>
    %471 = vector.shape_cast %449 : vector<32xf32> to vector<1x32xf32>
    %472 = vector.broadcast %471 : vector<1x32xf32> to vector<8x32xf32>
    %473 = arith.addf %470, %472 : vector<8x32xf32>
    %c0_152 = arith.constant 0 : index
    %c0_153 = arith.constant 0 : index
    %c0_154 = arith.constant 0 : index
    %474 = vector.load %arg9[%c0_152, %c0_153, %c0_154] : memref<1x8x32xf32, #tpu.memory_space<vmem>>, vector<1x8x32xf32>
    %475 = vector.shape_cast %474 : vector<1x8x32xf32> to vector<8x32xf32>
    %476 = vector.shape_cast %473 : vector<8x32xf32> to vector<1x8x32xf32>
    tpu.vector_store %arg9[%c0_152, %c0_153, %c0_154], %476 {strides = array<i32>} : memref<1x8x32xf32, #tpu.memory_space<vmem>>, vector<1x8x32xf32>,
    return
  }
  func.func @transform_0(%arg0: i32) -> (i32, i32, i32) {
    %c0_i32 = arith.constant 0 : i32
    %c0_i32_0 = arith.constant 0 : i32
    %c0_i32_1 = arith.constant 0 : i32
    return %arg0, %c0_i32, %c0_i32_0 : i32, i32, i32
  }
  func.func @transform_1(%arg0: i32) -> (i32, i32, i32) {
    %c0_i32 = arith.constant 0 : i32
    %c0_i32_0 = arith.constant 0 : i32
    %c0_i32_1 = arith.constant 0 : i32
    %c0_i32_2 = arith.constant 0 : i32
    return %c0_i32, %c0_i32_0, %c0_i32_1 : i32, i32, i32
  }
  func.func @transform_2(%arg0: i32) -> (i32, i32, i32) {
    %c0_i32 = arith.constant 0 : i32
    %c0_i32_0 = arith.constant 0 : i32
    %c0_i32_1 = arith.constant 0 : i32
    %c0_i32_2 = arith.constant 0 : i32
    return %c0_i32, %c0_i32_0, %c0_i32_1 : i32, i32, i32
  }
  func.func @transform_3(%arg0: i32) -> (i32, i32, i32) {
    %c0_i32 = arith.constant 0 : i32
    %c0_i32_0 = arith.constant 0 : i32
    %c0_i32_1 = arith.constant 0 : i32
    %c0_i32_2 = arith.constant 0 : i32
    return %c0_i32, %c0_i32_0, %c0_i32_1 : i32, i32, i32
  }
  func.func @transform_4(%arg0: i32) -> (i32, i32, i32) {
    %c0_i32 = arith.constant 0 : i32
    %c0_i32_0 = arith.constant 0 : i32
    %c0_i32_1 = arith.constant 0 : i32
    %c0_i32_2 = arith.constant 0 : i32
    return %c0_i32, %c0_i32_0, %c0_i32_1 : i32, i32, i32
  }
  func.func @transform_5(%arg0: i32) -> (i32, i32, i32) {
    %c0_i32 = arith.constant 0 : i32
    %c0_i32_0 = arith.constant 0 : i32
    %c0_i32_1 = arith.constant 0 : i32
    %c0_i32_2 = arith.constant 0 : i32
    return %c0_i32, %c0_i32_0, %c0_i32_1 : i32, i32, i32
  }
  func.func @transform_6(%arg0: i32) -> (i32, i32, i32) {
    %c0_i32 = arith.constant 0 : i32
    %c0_i32_0 = arith.constant 0 : i32
    %c0_i32_1 = arith.constant 0 : i32
    %c0_i32_2 = arith.constant 0 : i32
    return %c0_i32, %c0_i32_0, %c0_i32_1 : i32, i32, i32
  }
  func.func @transform_7(%arg0: i32) -> (i32, i32, i32) {
    %c0_i32 = arith.constant 0 : i32
    %c0_i32_0 = arith.constant 0 : i32
    %c0_i32_1 = arith.constant 0 : i32
    %c0_i32_2 = arith.constant 0 : i32
    return %c0_i32, %c0_i32_0, %c0_i32_1 : i32, i32, i32
  }
  func.func @transform_8(%arg0: i32) -> (i32, i32, i32) {
    %c0_i32 = arith.constant 0 : i32
    %c0_i32_0 = arith.constant 0 : i32
    %c0_i32_1 = arith.constant 0 : i32
    return %arg0, %c0_i32, %c0_i32_0 : i32, i32, i32
  }
}

</mosaic_0001>

<bundles_post_ra>
// kernel: tpu_custom_call.1
= control target key start
LH: loop header
LB: loop body
LE: loop exit
PB: predicated region body
PF: predicated region fallthrough
CT: control target
= control target key end

     0   :  { %13 = vsyncpa [#allocation3], 0  ;;  %s6381_s0 = inlined_call_operand.vmem [shape: f32[2,8,32], index: 0, kind: input, shape index: {}]   ;;  %s6382_s1 = inlined_call_operand.vmem [shape: f32[2,32,192], index: 1, kind: input, shape index: {}]   ;;  %s6383_s2 = inlined_call_operand.vmem [shape: f32[2,1,192], index: 2, kind: input, shape index: {}]   ;;  %s6384_s3 = inlined_call_operand.vmem [shape: f32[2,64,32], index: 3, kind: input, shape index: {}]   ;;  %s6385_s4 = inlined_call_operand.vmem [shape: f32[2,32,64], index: 4, kind: input, shape index: {}]   ;;  %s6386_s5 = inlined_call_operand.vmem [shape: f32[2,1,64], index: 5, kind: input, shape index: {}]   ;;  %s6387_s6 = inlined_call_operand.vmem [shape: f32[2,64,32], index: 6, kind: input, shape index: {}]   ;;  %s6388_s7 = inlined_call_operand.vmem [shape: f32[2,6,32], index: 7, kind: input, shape index: {}]   ;;  %s6389_s8 = inlined_call_operand.hbm [shape: f32[2,8,32], index: 8, kind: output, shape index: {}]  }
   0x1   :  { %15 = vsyncpa [#allocation3 + $0x1], 0  ;;  %s5645_s27 = smov 0   ;;  %s5647_s28 = smov 0  }
   0x2   :  { %s5649_s29 = smov 0   ;;  %s5651_s30 = smov 0  }
   0x3 LB: > { %s5666_s9 = sadd.s32 4294967295, %s5580_s30   ;;  %s4855_s10 = sadd.s32 4294967294, %s5580_s30   ;;  %s5580_s30 = sphi %s5651_s30, %s6423_s30   ;;  %s5576_s29 = sphi %s5649_s29, %s6422_s29   ;;  %s5572_s28 = sphi %s5647_s28, %s6421_s28   ;;  %s5568_s27 = sphi %s5645_s27, %s6420_s27  }
   0x4   : > { %s5670_s11 = sadd.s32 1, %s5580_s30   ;;  %s201_s12 = sadd.s32 1, %s5576_s29 }
   0x5   : > { %s198_s13 = ssub.s32 %s5580_s30, %s5670_s11  ;;  %p211_p0 = scmp.ne.s32.totalorder %s5576_s29, %s5572_s28 }
   0x6   : > { %p199_p1 = scmp.eq.s32.totalorder %s198_s13, 0  ;;  %p212_p2 = scmp.eq.s32.totalorder %s5666_s9, 1 }
   0x7   : > { %p217_p3 = scmp.ne.s32.totalorder %s5572_s28, %s5568_s27  ;;  %p218_p4 = scmp.eq.s32.totalorder %s4855_s10, 1 }
   0x8   : > { %s5681_s14 = scalar_select %p199_p1, %s5576_s29, %s201_s12  }
   0x9   : > { %p5683_p5 = por %p212_p2, %p211_p0  ;;  %p5687_p6 = por %p218_p4, %p217_p3 }
   0xa   : > { %p4858_p7 = scmp.ge.s32.totalorder %s5580_s30, 1  ;;  %p264_p8 = scmp.lt.s32.totalorder %s5580_s30, 3 }
   0xc   : > { %p265_p9 = pnand %p4858_p7, %p264_p8 }
   0xd   : > { %p297_p10 = scmp.lt.s32.totalorder (!%p265_p9), %s5666_s9, 1  ;;  %s5585_s12 = smov (!%p265_p9), 96  }
   0xe   : > { %268 = sbr.rel (%p265_p9) target bundleno = 10983 (0x2ae7), region = 52  ;;  %s5586_s13 = smov (!%p265_p9), 88  }
   0xf   : > { %s6405_s17 = smov (!%p265_p9), 56   ;;  %s6402_s18 = smov (!%p265_p9), 64  }
  0x10   : > { %s6400_s20 = smov (!%p265_p9), 112   ;;  %s6398_s25 = smov (!%p265_p9), 72  }
  0x11   : > { %s6396_s26 = smov (!%p265_p9), 104   ;;  %s6395_s21 = smov (!%p265_p9), 48  }
  0x12   : > { %s6390_s22 = smov (!%p265_p9), 32   ;;  %s6411_s23 = smov (!%p265_p9), 112  }
  0x13   : > { %v309_v0 = vld [vmem:[%s6382_s1 + $0x38] sm:$0xff]  ;;  %v308_v1 = vld [vmem:[%s6382_s1 + $0x30] sm:$0xff]  ;;  %v307_v2 = vld [vmem:[%s6382_s1 + $0x28] sm:$0xff]  ;;  %v5582_v4 = vmov 0.0   ;;  %s298_s10 = scalar_select %p297_p10, %s5666_s9, 1  ;;  %vm344_vm0 = vcmask 261120   ;;  %v334_v10 = vlaneseq }
  0x14   : > { %372 = vmatprep.subr.mxu0 %v309_v0  ;;  %v306_v3 = vld [vmem:[%s6382_s1 + $0x20] sm:$0xff]  ;;  %412 = vmatprep.mubr.f32.mxu0 %v5582_v4  ;;  %v305_v5 = vld [vmem:[%s6382_s1 + $0x18] sm:$0xff]  ;;  %v304_v6 = vld [vmem:[%s6382_s1 + $0x10] sm:$0xff]  ;;  %vm5583_vm1 = vmmov 0   ;;  %vm422_vm2 = vcmask 64512   ;;  %vm2442_vm3 = vcmask 523264  }
  0x15   : > { %373 = vmatpush1.msra.mxu0 %v308_v1  ;;  %5097 = vmatprep.subr.mxu1 %v5582_v4  ;;  %v303_v7 = vld [vmem:[%s6382_s1 + $0x8] sm:$0xff]  ;;  %s4860_s19 = sshll.u32 %s298_s10, 3  ;;  %v302_v8 = vld [vmem:[%s6382_s1] sm:$0xff]  ;;  %v5729_v11 = vshrl.u32 %v334_v10, 7  ;;  %s5584_s10 = smov 120   ;;  %v313_v10 = vld [vmem:[%s6384_s3 + $0x10] sm:$0xff] }
  0x16   : > { %374 = vmatprep.subr.mxu0 %v307_v2  ;;  %s300_s24 = scalar_lea.vmem %s6381_s0, %s4860_s19  ;;  %5099 = vmatprep.mubr.msk.f32.mxu1 %vm5583_vm1, %v5582_v4  ;;  %v5741_v13 = vld [vmem:[%s6383_s2] sm:$0x3]  ;;  %s6403_s19 = smov 80   ;;  %v312_v46 = vld [vmem:[%s6384_s3 + $0x8] sm:$0xff] }
  0x17   : > { %375 = vmatpush1.msra.mxu0 %v306_v3  ;;  %v5724_v9 = vld [vmem:[%s300_s24] sm:$0xff]  ;;  %v5736_v12 = vsub.s32 0, %v5729_v11  ;;  %s6394_s24 = smov 40  }
  0x18   : > { %376 = vmatprep.subr.mxu0 %v305_v5  ;;  %v311_v45 = vld [vmem:[%s6384_s3] sm:$0xff] }
  0x19   : > { %377 = vmatpush1.msra.mxu0 %v304_v6  ;;  %v337_v14 = vrot.slane %v5741_v13, %v5736_v12 }
  0x1a   : > { %378 = vmatprep.subr.mxu0 %v303_v7 }
  0x1b   : > { %379 = vmatpush1.msra.mxu0 %v302_v8 }
  0x1c   : > { %4861 = vmatmul.mubr.msk.f32.vlgmr.msra.gmra.mxu0 %vm344_vm0, %v5724_v9  ;;  %5092 = vmatprep.subr.mxu0 %v5582_v4 }
  0x1d   : > { %5094 = vmatprep.mubr.msk.f32.mxu0 %vm5583_vm1, %v5582_v4 }
  0xdc   : > { %v414_v15 = vpop.f32.mrf.mxu0 }
  0xdd   : > { %v5745_v16 = vadd.f32 %v414_v15, %v337_v14 }
  0xde   : > { %v5764_v20 = vpop.f32.mrf.mxu0 }
  0xdf   : > { %584 = vrot.lane.b32.xlu1 %v5745_v16, %s5584_s10  ;;  %420 = vrot.lane.b32.xlu0 %v5745_v16, %s5585_s12 }
  0xe3   : > { %586 = vrot.lane.b32.xlu0 %v5745_v16, %s5586_s13 }
 0x151   : > { %v421_v17 = vpop.permute.xlu0 %420  ;;  %v585_v19 = vpop.permute.xlu1 %584 }
 0x152   : > { %5093 = vmatpush3.xpose.msk.msra.mxu0 %vm422_vm2, %v421_v17 }
 0x153   : > { %5102 = vmatprep.subr.mxu0 %v5582_v4 }
 0x155   : > { %5095 = vmatmul.mubr.msk.f32.vlgmr.msra.gmra.mxu0 %vm422_vm2, %v5745_v16  ;;  %v587_v18 = vpop.permute.xlu0 %586 }
 0x156   : > { %5103 = vmatpush3.xpose.msk.msra.mxu0 %vm422_vm2, %v587_v18  ;;  %5104 = vmatprep.mubr.msk.f32.mxu0 %vm5583_vm1, %v5582_v4 }
 0x157   : > { %5112 = vmatprep.subr.mxu0 %v5582_v4 }
 0x159   : > { %5105 = vmatmul.mubr.msk.f32.vlgmr.msra.gmra.mxu0 %vm422_vm2, %v585_v19 }
 0x15a   : > { %5114 = vmatprep.mubr.msk.f32.mxu0 %vm5583_vm1, %v5582_v4  ;;  %5113 = vmatpush3.msra.mxu0 %v312_v46 }
 0x15b   : > { %5122 = vmatprep.subr.mxu0 %v5582_v4 }
 0x215   : > { %v493_v21 = vpop.f32.mrf.mxu0 }
 0x216   : > { %v497_v22 = vsel %vm422_vm2, %v493_v21, -inf }
 0x217   : > { %498 = vmax.xlane.f32.xlu1 %v497_v22  ;;  %v5096_v23 = vpop.f32.mrf.mxu0 }
 0x219   : > { %v658_v24 = vpop.f32.mrf.mxu0 }
 0x21a   : > { %v662_v25 = vsel %vm422_vm2, %v658_v24, -inf }
 0x21b   : > { %663 = vmax.xlane.f32.xlu0 %v662_v25  ;;  %v5106_v26 = vpop.f32.mrf.mxu0 }
 0x2a0   : > { %v499_v27 = vpop.xlane.xlu1 %498 }
 0x2a1   : > { %v500_v28 = vsub.f32 %v493_v21, %v499_v27 }
 0x2a3   : > { %v501_v29 = vmul.f32 1.442695, %v500_v28 }
 0x2a4   : > { %v664_v30 = vpop.xlane.xlu0 %663 }
 0x2a5   : > { %5448 = vpow2.f32 %v501_v29  ;;  %v665_v31 = vsub.f32 %v658_v24, %v664_v30 }
 0x2a7   : > { %v666_v32 = vmul.f32 1.442695, %v665_v31  ;;  %v5837_v31 = vsub.s32 1, %v5729_v11 }
 0x2a9   : > { %5450 = vpow2.f32 %v666_v32  ;;  %v341_v32 = vrot.slane %v5741_v13, %v5837_v31  ;;  %v314_v13 = vld [vmem:[%s6384_s3 + $0x18] sm:$0xff] }
 0x2b2   : > { %v5449_v33 = vpop.eup %5448 }
 0x2b3   : > { %v503_v34 = vsel %vm422_vm2, %v5449_v33, 0.0 }
 0x2b4   : > { %504 = vadd.xlane.f32.xlu0 %v503_v34 }
 0x2b6   : > { %v5451_v35 = vpop.eup %5450 }
 0x2b7   : > { %v668_v36 = vsel %vm422_vm2, %v5451_v35, 0.0 }
 0x2b8   : > { %669 = vadd.xlane.f32.xlu1 %v668_v36 }
 0x2c9   : > { %673 = vrot.lane.b32.xlu1 %v5745_v16, %s6405_s17  ;;  %s6412_s17 = smov 72  }
 0x2ca   : > { %508 = vrot.lane.b32.xlu0 %v5745_v16, %s6402_s18  ;;  %s6416_s18 = smov 32  }
 0x2cd   : > { %897 = vrot.lane.b32.xlu1 %v5745_v16, %s6403_s19 }
 0x2ce   : > { %895 = vrot.lane.b32.xlu0 %v5745_v16, %s6400_s20 }
 0x33d   : > { %v505_v37 = vpop.xlane.xlu0 %504 }
 0x33e   : > { %5452 = vrcp.f32 %v505_v37 }
 0x341   : > { %v670_v38 = vpop.xlane.xlu1 %669  ;;  %v509_v39 = vpop.permute.xlu0 %508 }
 0x342   : > { %5454 = vrcp.f32 %v670_v38  ;;  %5098 = vmatpush3.msra.mxu1 %v509_v39 }
 0x343   : > { %5107 = vmatprep.subr.mxu1 %v5582_v4 }
 0x345   : > { %v674_v42 = vpop.permute.xlu1 %673  ;;  %v896_v52 = vpop.permute.xlu0 %895 }
 0x349   : > { %v898_v50 = vpop.permute.xlu1 %897 }
 0x34b   : > { %v5453_v40 = vpop.eup %5452 }
 0x34c   : > { %v507_v41 = vmul.f32 %v5453_v40, %v5449_v33 }
 0x34e   : > { %5100 = vmatmul.mubr.msk.f32.vlgmr.msra.gmra.mxu1 %vm422_vm2, %v507_v41 }
 0x34f   : > { %v5455_v43 = vpop.eup %5454  ;;  %5108 = vmatpush3.msra.mxu1 %v674_v42  ;;  %5109 = vmatprep.mubr.msk.f32.mxu1 %vm5583_vm1, %v5582_v4 }
 0x350   : > { %v672_v44 = vmul.f32 %v5455_v43, %v5451_v35  ;;  %5117 = vmatprep.subr.mxu1 %v5582_v4  ;;  %v5842_v35 = vadd.f32 %v5764_v20, %v341_v32 }
 0x352   : > { %5110 = vmatmul.mubr.msk.f32.vlgmr.msra.gmra.mxu1 %vm422_vm2, %v672_v44 }
 0x353   : > { %5119 = vmatprep.mubr.msk.f32.mxu1 %vm5583_vm1, %v5582_v4  ;;  %5118 = vmatpush3.msra.mxu1 %v311_v45 }
 0x354   : > { %5127 = vmatprep.subr.mxu1 %v5582_v4 }
 0x40e   : > { %v580_v47 = vpop.f32.mrf.mxu1 }
 0x40f   : > { %5120 = vmatmul.mubr.msk.f32.vlgmr.msra.gmra.mxu1 %vm422_vm2, %v580_v47 }
 0x410   : > { %v5101_v48 = vpop.f32.mrf.mxu1  ;;  %5129 = vmatprep.mubr.msk.f32.mxu1 %vm5583_vm1, %v5582_v4 }
 0x412   : > { %v745_v49 = vpop.f32.mrf.mxu1 }
 0x413   : > { %5115 = vmatmul.mubr.msk.f32.vlgmr.msra.gmra.mxu0 %vm422_vm2, %v745_v49 }
 0x414   : > { %5123 = vmatpush3.xpose.msk.msra.mxu0 %vm422_vm2, %v898_v50  ;;  %v5111_v51 = vpop.f32.mrf.mxu1  ;;  %5124 = vmatprep.mubr.msk.f32.mxu0 %vm5583_vm1, %v5582_v4 }
 0x415   : > { %5132 = vmatprep.subr.mxu0 %v5582_v4 }
 0x417   : > { %5125 = vmatmul.mubr.msk.f32.vlgmr.msra.gmra.mxu0 %vm422_vm2, %v896_v52 }
 0x418   : > { %5134 = vmatprep.mubr.msk.f32.mxu0 %vm5583_vm1, %v5582_v4  ;;  %5133 = vmatpush3.msra.mxu0 %v313_v10 }
 0x419   : > { %5142 = vmatprep.subr.mxu0 %v5582_v4 }
 0x4cf   : > { %v891_v53 = vpop.f32.mrf.mxu1 }
 0x4d1   : > { %v5121_v54 = vpop.f32.mrf.mxu1 }
 0x4d3   : > { %v818_v55 = vpop.f32.mrf.mxu0 }
 0x4d4   : > { %v892_v56 = vadd.f32 %v891_v53, %v818_v55  ;;  %v315_v55 = vld [vmem:[%s6384_s3 + $0x20] sm:$0xff] }
 0x4d5   : > { %v5116_v57 = vpop.f32.mrf.mxu0 }
 0x4d7   : > { %v969_v58 = vpop.f32.mrf.mxu0 }
 0x4d8   : > { %v973_v59 = vsel %vm422_vm2, %v969_v58, -inf }
 0x4d9   : > { %974 = vmax.xlane.f32.xlu1 %v973_v59  ;;  %v5126_v60 = vpop.f32.mrf.mxu0 }
 0x4ea   : > { %1136 = vrot.lane.b32.xlu1 %v5745_v16, %s6398_s25 }
 0x4ee   : > { %1134 = vrot.lane.b32.xlu1 %v5745_v16, %s6396_s26 }
 0x562   : > { %v975_v61 = vpop.xlane.xlu1 %974 }
 0x563   : > { %v976_v62 = vsub.f32 %v969_v58, %v975_v61 }
 0x565   : > { %v977_v63 = vmul.f32 1.442695, %v976_v62 }
 0x566   : > { %v1137_v6 = vpop.permute.xlu1 %1136 }
 0x567   : > { %5456 = vpow2.f32 %v977_v63 }
 0x56a   : > { %v1135_v8 = vpop.permute.xlu1 %1134 }
 0x574   : > { %v5457_v0 = vpop.eup %5456 }
 0x575   : > { %v979_v1 = vsel %vm422_vm2, %v5457_v0, 0.0 }
 0x576   : > { %980 = vadd.xlane.f32.xlu0 %v979_v1 }
 0x58c   : > { %984 = vrot.lane.b32.xlu0 %v5745_v16, %s6395_s21  ;;  %s6409_s21 = smov 80  }
 0x5ff   : > { %v981_v2 = vpop.xlane.xlu0 %980 }
 0x600   : > { %5458 = vrcp.f32 %v981_v2 }
 0x603   : > { %v985_v3 = vpop.permute.xlu0 %984 }
 0x604   : > { %5128 = vmatpush3.msra.mxu1 %v985_v3 }
 0x605   : > { %5137 = vmatprep.subr.mxu1 %v5582_v4 }
 0x60d   : > { %v5459_v5 = vpop.eup %5458 }
 0x60e   : > { %v983_v7 = vmul.f32 %v5459_v5, %v5457_v0 }
 0x610   : > { %5130 = vmatmul.mubr.msk.f32.vlgmr.msra.gmra.mxu1 %vm422_vm2, %v983_v7 }
 0x611   : > { %5138 = vmatpush3.xpose.msk.msra.mxu1 %vm422_vm2, %v1137_v6  ;;  %5139 = vmatprep.mubr.msk.f32.mxu1 %vm5583_vm1, %v5582_v4 }
 0x612   : > { %5147 = vmatprep.subr.mxu1 %v5582_v4 }
 0x614   : > { %5140 = vmatmul.mubr.msk.f32.vlgmr.msra.gmra.mxu1 %vm422_vm2, %v1135_v8 }
 0x615   : > { %5149 = vmatprep.mubr.msk.f32.mxu1 %vm5583_vm1, %v5582_v4  ;;  %5148 = vmatpush3.msra.mxu1 %v314_v13 }
 0x616   : > { %5157 = vmatprep.subr.mxu1 %v5582_v4 }
 0x6d0   : > { %v1056_v14 = vpop.f32.mrf.mxu1 }
 0x6d1   : > { %5135 = vmatmul.mubr.msk.f32.vlgmr.msra.gmra.mxu0 %vm422_vm2, %v1056_v14 }
 0x6d2   : > { %v5131_v15 = vpop.f32.mrf.mxu1  ;;  %5144 = vmatprep.mubr.msk.f32.mxu0 %vm5583_vm1, %v5582_v4 }
 0x6d4   : > { %v1208_v17 = vpop.f32.mrf.mxu1 }
 0x6d5   : > { %v1212_v18 = vsel %vm422_vm2, %v1208_v17, -inf }
 0x6d6   : > { %1213 = vmax.xlane.f32.xlu0 %v1212_v18  ;;  %v5141_v19 = vpop.f32.mrf.mxu1 }
 0x6ec   : > { %1223 = vrot.lane.b32.xlu0 %v5745_v16, %s6394_s24  ;;  %s6410_s24 = smov 64  }
 0x75f   : > { %v1214_v21 = vpop.xlane.xlu0 %1213 }
 0x760   : > { %v1215_v22 = vsub.f32 %v1208_v17, %v1214_v21  ;;  %v316_v17 = vld [vmem:[%s6384_s3 + $0x28] sm:$0xff] }
 0x762   : > { %v1216_v23 = vmul.f32 1.442695, %v1215_v22 }
 0x763   : > { %v1224_v24 = vpop.permute.xlu0 %1223 }
 0x764   : > { %5460 = vpow2.f32 %v1216_v23  ;;  %5143 = vmatpush3.msra.mxu0 %v1224_v24 }
 0x765   : > { %5152 = vmatprep.subr.mxu0 %v5582_v4 }
 0x771   : > { %v5461_v25 = vpop.eup %5460 }
 0x772   : > { %v1218_v26 = vsel %vm422_vm2, %v5461_v25, 0.0 }
 0x773   : > { %1219 = vadd.xlane.f32.xlu1 %v1218_v26 }
 0x784   : > { %1373 = vrot.lane.b32.xlu1 %v5745_v16, %s6390_s22  ;;  %s6391_s22 = smov 24  }
 0x791   : > { %v1129_v27 = vpop.f32.mrf.mxu0 }
 0x792   : > { %v1133_v28 = vadd.f32 %v1129_v27, %v892_v56 }
 0x793   : > { %v5136_v29 = vpop.f32.mrf.mxu0 }
 0x7fc   : > { %v1220_v30 = vpop.xlane.xlu1 %1219 }
 0x7fd   : > { %5462 = vrcp.f32 %v1220_v30 }
 0x800   : > { %v1374_v36 = vpop.permute.xlu1 %1373 }
 0x80a   : > { %v5463_v33 = vpop.eup %5462 }
 0x80b   : > { %v1222_v34 = vmul.f32 %v5463_v33, %v5461_v25 }
 0x80d   : > { %5145 = vmatmul.mubr.msk.f32.vlgmr.msra.gmra.mxu0 %vm422_vm2, %v1222_v34 }
 0x80e   : > { %5153 = vmatpush3.xpose.msk.msra.mxu0 %vm422_vm2, %v5842_v35  ;;  %5154 = vmatprep.mubr.msk.f32.mxu0 %vm5583_vm1, %v5582_v4 }
 0x80f   : > { %5162 = vmatprep.subr.mxu0 %v5582_v4 }
 0x811   : > { %5155 = vmatmul.mubr.msk.f32.vlgmr.msra.gmra.mxu0 %vm422_vm2, %v1374_v36 }
 0x812   : > { %5164 = vmatprep.mubr.msk.f32.mxu0 %vm5583_vm1, %v5582_v4  ;;  %5163 = vmatpush3.msra.mxu0 %v315_v55 }
 0x813   : > { %5172 = vmatprep.subr.mxu0 %v5582_v4 }
 0x8cd   : > { %v1295_v20 = vpop.f32.mrf.mxu0 }
 0x8ce   : > { %5150 = vmatmul.mubr.msk.f32.vlgmr.msra.gmra.mxu1 %vm422_vm2, %v1295_v20 }
 0x8cf   : > { %v5146_v37 = vpop.f32.mrf.mxu0  ;;  %5159 = vmatprep.mubr.msk.f32.mxu1 %vm5583_vm1, %v5582_v4 }
 0x8d0   : > { %v317_v37 = vld [vmem:[%s6384_s3 + $0x30] sm:$0xff] }
 0x8d1   : > { %v1446_v38 = vpop.f32.mrf.mxu0 }
 0x8d2   : > { %v1450_v39 = vsel %vm422_vm2, %v1446_v38, -inf }
 0x8d3   : > { %1451 = vmax.xlane.f32.xlu0 %v1450_v39  ;;  %v5156_v40 = vpop.f32.mrf.mxu0 }
 0x8e9   : > { %1461 = vrot.lane.b32.xlu0 %v5842_v35, %s5585_s12 }
 0x8ed   : > { %1611 = vrot.lane.b32.xlu0 %v5745_v16, %s6391_s22  ;;  %s6392_s22 = smov 16  }
 0x95c   : > { %v1452_v41 = vpop.xlane.xlu0 %1451 }
 0x95d   : > { %v1453_v42 = vsub.f32 %v1446_v38, %v1452_v41 }
 0x95f   : > { %v1454_v43 = vmul.f32 1.442695, %v1453_v42 }
 0x960   : > { %v1462_v44 = vpop.permute.xlu0 %1461 }
 0x961   : > { %5464 = vpow2.f32 %v1454_v43  ;;  %5158 = vmatpush3.msra.mxu1 %v1462_v44 }
 0x962   : > { %5167 = vmatprep.subr.mxu1 %v5582_v4 }
 0x964   : > { %v1612_v54 = vpop.permute.xlu0 %1611 }
 0x96e   : > { %v5465_v45 = vpop.eup %5464 }
 0x96f   : > { %v1456_v46 = vsel %vm422_vm2, %v5465_v45, 0.0 }
 0x970   : > { %1457 = vadd.xlane.f32.xlu1 %v1456_v46 }
 0x981   : > { %1613 = vrot.lane.b32.xlu1 %v5842_v35, %s5584_s10 }
 0x98e   : > { %v1368_v47 = vpop.f32.mrf.mxu1 }
 0x98f   : > { %v1372_v48 = vadd.f32 %v1368_v47, %v1133_v28 }
 0x990   : > { %v5151_v49 = vpop.f32.mrf.mxu1 }
 0x9f9   : > { %v1458_v50 = vpop.xlane.xlu1 %1457 }
 0x9fa   : > { %5466 = vrcp.f32 %v1458_v50 }
 0x9fd   : > { %v1614_v53 = vpop.permute.xlu1 %1613 }
 0xa07   : > { %v5467_v51 = vpop.eup %5466 }
 0xa08   : > { %v1460_v52 = vmul.f32 %v5467_v51, %v5465_v45 }
 0xa0a   : > { %5160 = vmatmul.mubr.msk.f32.vlgmr.msra.gmra.mxu1 %vm422_vm2, %v1460_v52 }
 0xa0b   : > { %5168 = vmatpush3.xpose.msk.msra.mxu1 %vm422_vm2, %v1614_v53  ;;  %5169 = vmatprep.mubr.msk.f32.mxu1 %vm5583_vm1, %v5582_v4 }
 0xa0c   : > { %5177 = vmatprep.subr.mxu1 %v5582_v4 }
 0xa0e   : > { %5170 = vmatmul.mubr.msk.f32.vlgmr.msra.gmra.mxu1 %vm422_vm2, %v1612_v54 }
 0xa0f   : > { %5179 = vmatprep.mubr.msk.f32.mxu1 %vm5583_vm1, %v5582_v4  ;;  %5178 = vmatpush3.msra.mxu1 %v316_v17  ;;  %v329_v17 = vld [vmem:[%s6387_s6 + $0x28] sm:$0xff] }
 0xa10   : > { %5187 = vmatprep.subr.mxu1 %v5582_v4 }
 0xaca   : > { %v1533_v56 = vpop.f32.mrf.mxu1 }
 0xacb   : > { %5165 = vmatmul.mubr.msk.f32.vlgmr.msra.gmra.mxu0 %vm422_vm2, %v1533_v56 }
 0xacc   : > { %v5161_v57 = vpop.f32.mrf.mxu1  ;;  %5174 = vmatprep.mubr.msk.f32.mxu0 %vm5583_vm1, %v5582_v4 }
 0xacd   : > { %v5950_v57 = vld [vmem:[%s6388_s7] sm:$0x3f] }
 0xace   : > { %v1685_v58 = vpop.f32.mrf.mxu1 }
 0xacf   : > { %v1689_v59 = vsel %vm422_vm2, %v1685_v58, -inf }
 0xad0   : > { %1690 = vmax.xlane.f32.xlu1 %v1689_v59  ;;  %v5171_v60 = vpop.f32.mrf.mxu1 }
 0xad1   : > { %v2332_v60 = vrot.slane %v5950_v57, %v5736_v12 }
 0xae1   : > { %1852 = vrot.lane.b32.xlu1 %v5842_v35, %s6400_s20  ;;  %s5599_s20 = smov [#allocation2]  }
 0xae5   : > { %1850 = vrot.lane.b32.xlu1 %v5745_v16, %s6392_s22  ;;  %s6393_s22 = smov 8  }
 0xb59   : > { %v1691_v61 = vpop.xlane.xlu1 %1690 }
 0xb5a   : > { %v1692_v62 = vsub.f32 %v1685_v58, %v1691_v61 }
 0xb5c   : > { %v1693_v63 = vmul.f32 1.442695, %v1692_v62 }
 0xb5d   : > { %v1853_v10 = vpop.permute.xlu1 %1852 }
 0xb5e   : > { %5468 = vpow2.f32 %v1693_v63 }
 0xb61   : > { %v1851_v15 = vpop.permute.xlu1 %1850 }
 0xb6b   : > { %v5469_v0 = vpop.eup %5468 }
 0xb6c   : > { %v1695_v1 = vsel %vm422_vm2, %v5469_v0, 0.0 }
 0xb6d   : > { %1696 = vadd.xlane.f32.xlu0 %v1695_v1 }
 0xb83   : > { %1700 = vrot.lane.b32.xlu0 %v5842_v35, %s5586_s13 }
 0xb8b   : > { %v1606_v2 = vpop.f32.mrf.mxu0 }
 0xb8c   : > { %v1610_v3 = vadd.f32 %v1606_v2, %v1372_v48  ;;  %v318_v48 = vld [vmem:[%s6384_s3 + $0x38] sm:$0xff] }
 0xb8d   : > { %v5166_v5 = vpop.f32.mrf.mxu0 }
 0xbf6   : > { %v1697_v6 = vpop.xlane.xlu0 %1696 }
 0xbf7   : > { %5470 = vrcp.f32 %v1697_v6 }
 0xbfa   : > { %v1701_v7 = vpop.permute.xlu0 %1700 }
 0xbfb   : > { %5173 = vmatpush3.msra.mxu0 %v1701_v7  ;;  %v322_v7 = vld [vmem:[%s6385_s4 + $0x18] sm:$0xff] }
 0xbfc   : > { %5182 = vmatprep.subr.mxu0 %v5582_v4 }
 0xc04   : > { %v5471_v8 = vpop.eup %5470 }
 0xc05   : > { %v1699_v14 = vmul.f32 %v5471_v8, %v5469_v0  ;;  %v320_v8 = vld [vmem:[%s6385_s4 + $0x8] sm:$0xff] }
 0xc07   : > { %5175 = vmatmul.mubr.msk.f32.vlgmr.msra.gmra.mxu0 %vm422_vm2, %v1699_v14  ;;  %v331_v14 = vld [vmem:[%s6387_s6 + $0x38] sm:$0xff] }
 0xc08   : > { %5183 = vmatpush3.xpose.msk.msra.mxu0 %vm422_vm2, %v1853_v10  ;;  %5184 = vmatprep.mubr.msk.f32.mxu0 %vm5583_vm1, %v5582_v4  ;;  %v319_v10 = vld [vmem:[%s6385_s4] sm:$0xff] }
 0xc09   : > { %5192 = vmatprep.subr.mxu0 %v5582_v4 }
 0xc0b   : > { %5185 = vmatmul.mubr.msk.f32.vlgmr.msra.gmra.mxu0 %vm422_vm2, %v1851_v15  ;;  %v330_v15 = vld [vmem:[%s6387_s6 + $0x30] sm:$0xff] }
 0xc0c   : > { %5194 = vmatprep.mubr.msk.f32.mxu0 %vm5583_vm1, %v5582_v4  ;;  %5193 = vmatpush3.msra.mxu0 %v317_v37 }
 0xc0d   : > { %5202 = vmatprep.subr.mxu0 %v5582_v4 }
 0xcc7   : > { %v1772_v18 = vpop.f32.mrf.mxu0 }
 0xcc8   : > { %5180 = vmatmul.mubr.msk.f32.vlgmr.msra.gmra.mxu1 %vm422_vm2, %v1772_v18  ;;  %v328_v18 = vld [vmem:[%s6387_s6 + $0x20] sm:$0xff] }
 0xcc9   : > { %v5176_v19 = vpop.f32.mrf.mxu0  ;;  %5189 = vmatprep.mubr.msk.f32.mxu1 %vm5583_vm1, %v5582_v4 }
 0xcca   : > { %v327_v19 = vld [vmem:[%s6387_s6 + $0x18] sm:$0xff] }
 0xccb   : > { %v1924_v21 = vpop.f32.mrf.mxu0 }
 0xccc   : > { %v1928_v22 = vsel %vm422_vm2, %v1924_v21, -inf }
 0xccd   : > { %1929 = vmax.xlane.f32.xlu0 %v1928_v22  ;;  %v5186_v23 = vpop.f32.mrf.mxu0 }
 0xce3   : > { %1939 = vrot.lane.b32.xlu0 %v5842_v35, %s6403_s19  ;;  %s6413_s19 = smov 104  }
 0xce7   : > { %2089 = vrot.lane.b32.xlu0 %v5745_v16, %s6393_s22  ;;  %s6408_s22 = smov 56  }
 0xd56   : > { %v1930_v24 = vpop.xlane.xlu0 %1929 }
 0xd57   : > { %v1931_v25 = vsub.f32 %v1924_v21, %v1930_v24  ;;  %v2350_v24 = vsub.s32 2, %v5729_v11 }
 0xd59   : > { %v1932_v26 = vmul.f32 1.442695, %v1931_v25  ;;  %v2355_v25 = vsub.s32 3, %v5729_v11 }
 0xd5a   : > { %v1940_v27 = vpop.permute.xlu0 %1939 }
 0xd5b   : > { %5472 = vpow2.f32 %v1932_v26  ;;  %5188 = vmatpush3.msra.mxu1 %v1940_v27  ;;  %v2351_v26 = vrot.slane %v5950_v57, %v2350_v24 }
 0xd5c   : > { %5197 = vmatprep.subr.mxu1 %v5582_v4 }
 0xd5e   : > { %v2090_v20 = vpop.permute.xlu0 %2089 }
 0xd68   : > { %v5473_v28 = vpop.eup %5472 }
 0xd69   : > { %v1934_v29 = vsel %vm422_vm2, %v5473_v28, 0.0 }
 0xd6a   : > { %1935 = vadd.xlane.f32.xlu1 %v1934_v29  ;;  %v2356_v29 = vrot.slane %v5950_v57, %v2355_v25 }
 0xd7b   : > { %2091 = vrot.lane.b32.xlu1 %v5842_v35, %s6396_s26  ;;  %s6415_s26 = smov 40  }
 0xd88   : > { %v1845_v30 = vpop.f32.mrf.mxu1 }
 0xd89   : > { %v1849_v32 = vadd.f32 %v1845_v30, %v1610_v3 }
 0xd8a   : > { %v5181_v33 = vpop.f32.mrf.mxu1 }
 0xd8b   : > { %v326_v33 = vld [vmem:[%s6387_s6 + $0x10] sm:$0xff] }
 0xdf3   : > { %v1936_v34 = vpop.xlane.xlu1 %1935 }
 0xdf4   : > { %5474 = vrcp.f32 %v1936_v34  ;;  %v325_v34 = vld [vmem:[%s6387_s6 + $0x8] sm:$0xff] }
 0xdf7   : > { %v2092_v13 = vpop.permute.xlu1 %2091 }
 0xe01   : > { %v5475_v16 = vpop.eup %5474 }
 0xe02   : > { %v1938_v36 = vmul.f32 %v5475_v16, %v5473_v28  ;;  %v324_v16 = vld [vmem:[%s6387_s6] sm:$0xff] }
 0xe04   : > { %5190 = vmatmul.mubr.msk.f32.vlgmr.msra.gmra.mxu1 %vm422_vm2, %v1938_v36  ;;  %v4894_v36 = vld [vmem:[%s6386_s5] ss:$0 sm:$0xff] }
 0xe05   : > { %5198 = vmatpush3.xpose.msk.msra.mxu1 %vm422_vm2, %v2092_v13  ;;  %5199 = vmatprep.mubr.msk.f32.mxu1 %vm5583_vm1, %v5582_v4 }
 0xe06   : > { %5207 = vmatprep.subr.mxu1 %v5582_v4 }
 0xe08   : > { %5200 = vmatmul.mubr.msk.f32.vlgmr.msra.gmra.mxu1 %vm422_vm2, %v2090_v20 }
 0xe09   : > { %5209 = vmatprep.mubr.msk.f32.mxu1 %vm5583_vm1, %v5582_v4  ;;  %5208 = vmatpush3.msra.mxu1 %v318_v48 }
 0xe0a   : > { %5223 = vmatprep.subr.mxu1 %v5582_v4 }
 0xec4   : > { %v2011_v38 = vpop.f32.mrf.mxu1 }
 0xec5   : > { %5195 = vmatmul.mubr.msk.f32.vlgmr.msra.gmra.mxu0 %vm422_vm2, %v2011_v38 }
 0xec6   : > { %v5191_v39 = vpop.f32.mrf.mxu1  ;;  %5204 = vmatprep.mubr.msk.f32.mxu0 %vm5583_vm1, %v5582_v4 }
 0xec7   : > { %v2441_v39 = vrot.slane %v5950_v57, %v5837_v31 }
 0xec8   : > { %v2163_v40 = vpop.f32.mrf.mxu1 }
 0xec9   : > { %v2167_v41 = vsel %vm422_vm2, %v2163_v40, -inf }
 0xeca   : > { %2168 = vmax.xlane.f32.xlu1 %v2167_v41  ;;  %v5201_v42 = vpop.f32.mrf.mxu1 }
 0xf53   : > { %v2169_v43 = vpop.xlane.xlu1 %2168 }
 0xf54   : > { %v2170_v44 = vsub.f32 %v2163_v40, %v2169_v43 }
 0xf56   : > { %v2171_v45 = vmul.f32 1.442695, %v2170_v44 }
 0xf58   : > { %5476 = vpow2.f32 %v2171_v45 }
 0xf65   : > { %v5477_v46 = vpop.eup %5476 }
 0xf66   : > { %v2173_v47 = vsel %vm422_vm2, %v5477_v46, 0.0 }
 0xf67   : > { %2174 = vadd.xlane.f32.xlu0 %v2173_v47 }
 0xf7d   : > { %2178 = vrot.lane.b32.xlu0 %v5842_v35, %s6398_s25  ;;  %s6418_s25 = smov 16  }
 0xf85   : > { %v2084_v49 = vpop.f32.mrf.mxu0 }
 0xf86   : > { %v2088_v50 = vadd.f32 %v2084_v49, %v1849_v32 }
 0xf87   : > { %v5196_v51 = vpop.f32.mrf.mxu0 }
 0xf88   : > { %v4903_v51 = vld [vmem:[%s6382_s1 + $0x70] sm:$0xff] }
 0xff0   : > { %v2175_v52 = vpop.xlane.xlu0 %2174 }
 0xff1   : > { %5478 = vrcp.f32 %v2175_v52  ;;  %v4902_v52 = vld [vmem:[%s6382_s1 + $0x68] sm:$0xff] }
 0xff4   : > { %v2179_v53 = vpop.permute.xlu0 %2178 }
 0xff5   : > { %5203 = vmatpush3.msra.mxu0 %v2179_v53  ;;  %v4901_v53 = vld [vmem:[%s6382_s1 + $0x60] sm:$0xff] }
 0xff6   : > { %5212 = vmatprep.subr.mxu0 %v5582_v4 }
 0xffe   : > { %v5479_v54 = vpop.eup %5478 }
 0xfff   : > { %v2177_v55 = vmul.f32 %v5479_v54, %v5477_v46  ;;  %v4900_v54 = vld [vmem:[%s6382_s1 + $0x58] sm:$0xff] }
0x1001   : > { %5205 = vmatmul.mubr.msk.f32.vlgmr.msra.gmra.mxu0 %vm422_vm2, %v2177_v55  ;;  %v4899_v55 = vld [vmem:[%s6382_s1 + $0x50] sm:$0xff] }
0x1002   : > { %5220 = vmatprep.mubr.msk.f32.mxu0 %vm5583_vm1, %v5582_v4  ;;  %5213 = vmatpush3.msra.mxu0 %v322_v7 }
0x1003   : > { %5214 = vmatprep.subr.mxu0 %v5582_v4 }
0x10c1   : > { %v2250_v35 = vpop.f32.mrf.mxu0 }
0x10c2   : > { %5210 = vmatmul.mubr.msk.f32.vlgmr.msra.gmra.mxu1 %vm422_vm2, %v2250_v35  ;;  %v4898_v35 = vld [vmem:[%s6382_s1 + $0x48] sm:$0xff] }
0x10c3   : > { %v5206_v56 = vpop.f32.mrf.mxu0  ;;  %5239 = vmatprep.mubr.msk.f32.mxu1 %vm5583_vm1, %v5582_v4  ;;  %5224 = vmatpush3.msra.mxu1 %v331_v14 }
0x10c4   : > { %5225 = vmatprep.subr.mxu1 %v5582_v4  ;;  %v4897_v56 = vld [vmem:[%s6382_s1 + $0x40] sm:$0xff] }
0x10c5   : > { %5226 = vmatpush3.msra.mxu1 %v330_v15 }
0x10c6   : > { %5227 = vmatprep.subr.mxu1 %v5582_v4 }
0x10c7   : > { %5228 = vmatpush3.msra.mxu1 %v329_v17 }
0x10c8   : > { %5229 = vmatprep.subr.mxu1 %v5582_v4 }
0x10c9   : > { %5230 = vmatpush3.msra.mxu1 %v328_v18 }
0x10ca   : > { %5231 = vmatprep.subr.mxu1 %v5582_v4 }
0x10cb   : > { %5232 = vmatpush3.msra.mxu1 %v327_v19 }
0x10cc   : > { %5233 = vmatprep.subr.mxu1 %v5582_v4 }
0x10cd   : > { %5234 = vmatpush3.msra.mxu1 %v326_v33 }
0x10ce   : > { %5235 = vmatprep.subr.mxu1 %v5582_v4 }
0x10cf   : > { %5236 = vmatpush3.msra.mxu1 %v325_v34 }
0x10d0   : > { %5237 = vmatprep.subr.mxu1 %v5582_v4 }
0x10d1   : > { %5238 = vmatpush3.msra.mxu1 %v324_v16 }
0x10d2   : > { %5247 = vmatprep.subr.mxu1 %v5582_v4 }
0x1182   : > { %v2323_v58 = vpop.f32.mrf.mxu1 }
0x1183   : > { %v2327_v59 = vadd.f32 %v2323_v58, %v2088_v50  ;;  %v4904_v50 = vld [vmem:[%s6382_s1 + $0x78] sm:$0xff] }
0x1184   : > { %v5211_v61 = vpop.f32.mrf.mxu1 }
0x1185   : > { %v2328_v62 = vadd.f32 %v2327_v59, %v5724_v9  ;;  %v321_v9 = vld [vmem:[%s6385_s4 + $0x10] sm:$0xff]  ;;  %v2532_v61 = vsub.s32 4, %v5729_v11 }
0x1186   : > { %5215 = vmatpush3.msra.mxu0 %v321_v9 }
0x1187   : > { %v2333_v63 = vadd.f32 %v2332_v60, %v2328_v62  ;;  %5216 = vmatprep.subr.mxu0 %v5582_v4  ;;  %v2537_v62 = vsub.s32 5, %v5729_v11 }
0x1188   : > { %5217 = vmatpush3.msra.mxu0 %v320_v8 }
0x1189   : > { %v2334_v0 = vsel %vm344_vm0, %v2333_v63, 0.0  ;;  %5218 = vmatprep.subr.mxu0 %v5582_v4 }
0x118a   : > { %2335 = vadd.xlane.f32.xlu1 %v2334_v0  ;;  %5219 = vmatpush3.msra.mxu0 %v319_v10 }
0x118b   : > { %2616 = vmatprep.subr.mxu0 %v4904_v50 }
0x1213   : > { %v2336_v1 = vpop.xlane.xlu1 %2335 }
0x1214   : > { %v2338_v2 = vmul.f32 0.03125, %v2336_v1 }
0x1216   : > { %v2339_v3 = vsub.f32 %v2333_v63, %v2338_v2  ;;  %v2533_v63 = vrot.slane %v5950_v57, %v2532_v61  ;;  %v2538_v2 = vrot.slane %v5950_v57, %v2537_v62 }
0x1218   : > { %v2340_v5 = vmul.f32 %v2339_v3, %v2339_v3 }
0x121a   : > { %v2341_v6 = vsel %vm344_vm0, %v2340_v5, 0.0 }
0x121b   : > { %2342 = vadd.xlane.f32.xlu1 %v2341_v6  ;;  %v6066_v6 = vld [vmem:[%s6383_s2 + $0x2] sm:$0x3] }
0x121c   : > { %v2582_v7 = vrot.slane %v6066_v6, %v5736_v12 }
0x12a4   : > { %v2343_v21 = vpop.xlane.xlu1 %2342 }
0x12a5   : > { %v2344_v22 = vmul.f32 0.03125, %v2343_v21 }
0x12a7   : > { %v2345_v23 = vadd.f32 1e-05, %v2344_v22 }
0x12a9   : > { %5480 = vrsqrt.f32 %v2345_v23 }
0x12b6   : > { %v5481_v27 = vpop.eup %5480 }
0x12b7   : > { %v2347_v28 = vmul.f32 %v5481_v27, %v2339_v3 }
0x12b9   : > { %v2352_v30 = vmul.f32 %v2351_v26, %v2347_v28 }
0x12bb   : > { %v2357_v32 = vadd.f32 %v2356_v29, %v2352_v30 }
0x12bd   : > { %5221 = vmatmul.mubr.msk.f32.vlgmr.msra.gmra.mxu0 %vm344_vm0, %v2357_v32 }
0x12be   : > { %2656 = vmatprep.mubr.f32.mxu0 %v5582_v4  ;;  %2617 = vmatpush1.msra.mxu0 %v4903_v51 }
0x12bf   : > { %2618 = vmatprep.subr.mxu0 %v4902_v52 }
0x12c0   : > { %2619 = vmatpush1.msra.mxu0 %v4901_v53 }
0x12c1   : > { %2620 = vmatprep.subr.mxu0 %v4900_v54 }
0x12c2   : > { %2621 = vmatpush1.msra.mxu0 %v4899_v55 }
0x12c3   : > { %2622 = vmatprep.subr.mxu0 %v4898_v35 }
0x12c4   : > { %2623 = vmatpush1.msra.mxu0 %v4897_v56 }
0x12c5   : > { %5242 = vmatprep.subr.mxu0 %v5582_v4 }
0x137d   : > { %v2433_v13 = vpop.f32.mrf.mxu0 }
0x137e   : > { %v2434_v20 = vadd.f32 %v4894_v36, %v2433_v13 }
0x137f   : > { %v5222_v37 = vpop.f32.mrf.mxu0 }
0x1380   : > { %v2437_v38 = vmax.f32 %v2434_v20, 0.0 }
0x1382   : > { %5240 = vmatmul.mubr.msk.f32.vlgmr.msra.gmra.mxu1 %vm2442_vm3, %v2437_v38 }
0x1383   : > { %5249 = vmatprep.mubr.msk.f32.mxu1 %vm5583_vm1, %v5582_v4 }
0x1442   : > { %v2512_v40 = vpop.f32.mrf.mxu1 }
0x1443   : > { %v2513_v41 = vadd.f32 %v2512_v40, %v2441_v39 }
0x1444   : > { %v5241_v42 = vpop.f32.mrf.mxu1 }
0x1445   : > { %v2516_v43 = vadd.f32 %v2513_v41, %v2357_v32 }
0x1447   : > { %v2517_v44 = vsel %vm344_vm0, %v2516_v43, 0.0 }
0x1448   : > { %2518 = vadd.xlane.f32.xlu1 %v2517_v44  ;;  %v4907_v44 = vld [vmem:[%s6384_s3 + $0x48] sm:$0xff] }
0x14d1   : > { %v2519_v45 = vpop.xlane.xlu1 %2518 }
0x14d2   : > { %v2520_v46 = vmul.f32 0.03125, %v2519_v45 }
0x14d4   : > { %v2521_v47 = vsub.f32 %v2516_v43, %v2520_v46  ;;  %v4906_v43 = vld [vmem:[%s6384_s3 + $0x40] sm:$0xff] }
0x14d6   : > { %v2522_v48 = vmul.f32 %v2521_v47, %v2521_v47 }
0x14d8   : > { %v2523_v49 = vsel %vm344_vm0, %v2522_v48, 0.0 }
0x14d9   : > { %2524 = vadd.xlane.f32.xlu1 %v2523_v49 }
0x1562   : > { %v2525_v58 = vpop.xlane.xlu1 %2524 }
0x1563   : > { %v2526_v59 = vmul.f32 0.03125, %v2525_v58 }
0x1565   : > { %v2527_v60 = vadd.f32 1e-05, %v2526_v59 }
0x1567   : > { %5482 = vrsqrt.f32 %v2527_v60 }
0x1574   : > { %v5483_v0 = vpop.eup %5482 }
0x1575   : > { %v2529_v1 = vmul.f32 %v5483_v0, %v2521_v47 }
0x1577   : > { %v2534_v3 = vmul.f32 %v2533_v63, %v2529_v1 }
0x1579   : > { %v6057_v5 = vadd.f32 %v2538_v2, %v2534_v3 }
0x157b   : > { %4928 = vmatmul.mubr.msk.f32.vlgmr.msra.gmra.mxu0 %vm344_vm0, %v6057_v5 }
0x157c   : > { %5244 = vmatprep.mubr.msk.f32.mxu0 %vm5583_vm1, %v5582_v4 }
0x163b   : > { %v2658_v9 = vpop.f32.mrf.mxu0 }
0x163c   : > { %v6070_v8 = vadd.f32 %v2658_v9, %v2582_v7 }
0x163d   : > { %v6089_v15 = vpop.f32.mrf.mxu0 }
0x163e   : > { %2829 = vrot.lane.b32.xlu0 %v6070_v8, %s5586_s13  ;;  %2664 = vrot.lane.b32.xlu1 %v6070_v8, %s5585_s12 }
0x1642   : > { %2827 = vrot.lane.b32.xlu0 %v6070_v8, %s5584_s10 }
0x16b0   : > { %v2665_v57 = vpop.permute.xlu1 %2664  ;;  %v2830_v10 = vpop.permute.xlu0 %2829 }
0x16b1   : > { %5243 = vmatpush3.xpose.msk.msra.mxu0 %vm422_vm2, %v2665_v57 }
0x16b2   : > { %5252 = vmatprep.subr.mxu0 %v5582_v4 }
0x16b4   : > { %5245 = vmatmul.mubr.msk.f32.vlgmr.msra.gmra.mxu0 %vm422_vm2, %v6070_v8  ;;  %v2828_v14 = vpop.permute.xlu0 %2827 }
0x16b5   : > { %5253 = vmatpush3.xpose.msk.msra.mxu0 %vm422_vm2, %v2830_v10  ;;  %5254 = vmatprep.mubr.msk.f32.mxu0 %vm5583_vm1, %v5582_v4 }
0x16b6   : > { %5262 = vmatprep.subr.mxu0 %v5582_v4 }
0x16b8   : > { %5255 = vmatmul.mubr.msk.f32.vlgmr.msra.gmra.mxu0 %vm422_vm2, %v2828_v14  ;;  %v4908_v14 = vld [vmem:[%s6384_s3 + $0x50] sm:$0xff] }
0x16b9   : > { %5264 = vmatprep.mubr.msk.f32.mxu0 %vm5583_vm1, %v5582_v4  ;;  %5263 = vmatpush3.msra.mxu0 %v4907_v44 }
0x16ba   : > { %5272 = vmatprep.subr.mxu0 %v5582_v4 }
0x1774   : > { %v2736_v17 = vpop.f32.mrf.mxu0 }
0x1775   : > { %v2740_v18 = vsel %vm422_vm2, %v2736_v17, -inf }
0x1776   : > { %2741 = vmax.xlane.f32.xlu0 %v2740_v18  ;;  %v5246_v19 = vpop.f32.mrf.mxu0 }
0x1778   : > { %v2901_v21 = vpop.f32.mrf.mxu0 }
0x1779   : > { %v2905_v22 = vsel %vm422_vm2, %v2901_v21, -inf }
0x177a   : > { %2906 = vmax.xlane.f32.xlu1 %v2905_v22  ;;  %v5256_v23 = vpop.f32.mrf.mxu0 }
0x178b   : > { %2916 = vrot.lane.b32.xlu1 %v6070_v8, %s6408_s22  ;;  %s6414_s22 = smov 48  }
0x178f   : > { %3140 = vrot.lane.b32.xlu1 %v6070_v8, %s6409_s21 }
0x17ff   : > { %v2742_v26 = vpop.xlane.xlu0 %2741 }
0x1800   : > { %v2743_v27 = vsub.f32 %v2736_v17, %v2742_v26 }
0x1802   : > { %v2744_v28 = vmul.f32 1.442695, %v2743_v27 }
0x1803   : > { %v2907_v29 = vpop.xlane.xlu1 %2906 }
0x1804   : > { %5484 = vpow2.f32 %v2744_v28  ;;  %v2908_v30 = vsub.f32 %v2901_v21, %v2907_v29 }
0x1806   : > { %v2909_v32 = vmul.f32 1.442695, %v2908_v30 }
0x1807   : > { %v2917_v40 = vpop.permute.xlu1 %2916 }
0x1808   : > { %5486 = vpow2.f32 %v2909_v32 }
0x180b   : > { %v3141_v48 = vpop.permute.xlu1 %3140 }
0x1811   : > { %v5485_v33 = vpop.eup %5484 }
0x1812   : > { %v2746_v34 = vsel %vm422_vm2, %v5485_v33, 0.0 }
0x1813   : > { %2747 = vadd.xlane.f32.xlu0 %v2746_v34 }
0x1815   : > { %v5487_v16 = vpop.eup %5486 }
0x1816   : > { %v2911_v36 = vsel %vm422_vm2, %v5487_v16, 0.0 }
0x1817   : > { %2912 = vadd.xlane.f32.xlu0 %v2911_v36  ;;  %v2586_v36 = vrot.slane %v6066_v6, %v5837_v31  ;;  %v4909_v6 = vld [vmem:[%s6384_s3 + $0x58] sm:$0xff] }
0x182d   : > { %2751 = vrot.lane.b32.xlu0 %v6070_v8, %s6410_s24  ;;  %s6417_s24 = smov 24  }
0x1831   : > { %3138 = vrot.lane.b32.xlu0 %v6070_v8, %s6411_s23 }
0x189c   : > { %v2748_v13 = vpop.xlane.xlu0 %2747 }
0x189d   : > { %5488 = vrcp.f32 %v2748_v13 }
0x18a0   : > { %v2913_v20 = vpop.xlane.xlu0 %2912 }
0x18a1   : > { %5490 = vrcp.f32 %v2913_v20 }
0x18a4   : > { %v2752_v37 = vpop.permute.xlu0 %2751 }
0x18a5   : > { %5248 = vmatpush3.msra.mxu1 %v2752_v37  ;;  %v6164_v37 = vadd.f32 %v6089_v15, %v2586_v36 }
0x18a6   : > { %5257 = vmatprep.subr.mxu1 %v5582_v4 }
0x18a8   : > { %v3139_v50 = vpop.permute.xlu0 %3138 }
0x18aa   : > { %v5489_v38 = vpop.eup %5488 }
0x18ab   : > { %v2750_v39 = vmul.f32 %v5489_v38, %v5485_v33 }
0x18ad   : > { %5250 = vmatmul.mubr.msk.f32.vlgmr.msra.gmra.mxu1 %vm422_vm2, %v2750_v39 }
0x18ae   : > { %v5491_v41 = vpop.eup %5490  ;;  %5258 = vmatpush3.msra.mxu1 %v2917_v40  ;;  %5259 = vmatprep.mubr.msk.f32.mxu1 %vm5583_vm1, %v5582_v4 }
0x18af   : > { %v2915_v42 = vmul.f32 %v5491_v41, %v5487_v16  ;;  %5267 = vmatprep.subr.mxu1 %v5582_v4 }
0x18b1   : > { %5260 = vmatmul.mubr.msk.f32.vlgmr.msra.gmra.mxu1 %vm422_vm2, %v2915_v42 }
0x18b2   : > { %5269 = vmatprep.mubr.msk.f32.mxu1 %vm5583_vm1, %v5582_v4  ;;  %5268 = vmatpush3.msra.mxu1 %v4906_v43 }
0x18b3   : > { %5277 = vmatprep.subr.mxu1 %v5582_v4 }
0x196d   : > { %v2823_v45 = vpop.f32.mrf.mxu1 }
0x196e   : > { %5270 = vmatmul.mubr.msk.f32.vlgmr.msra.gmra.mxu1 %vm422_vm2, %v2823_v45 }
0x196f   : > { %v5251_v46 = vpop.f32.mrf.mxu1  ;;  %5279 = vmatprep.mubr.msk.f32.mxu1 %vm5583_vm1, %v5582_v4 }
0x1971   : > { %v2988_v47 = vpop.f32.mrf.mxu1 }
0x1972   : > { %5265 = vmatmul.mubr.msk.f32.vlgmr.msra.gmra.mxu0 %vm422_vm2, %v2988_v47 }
0x1973   : > { %5273 = vmatpush3.xpose.msk.msra.mxu0 %vm422_vm2, %v3141_v48  ;;  %v5261_v49 = vpop.f32.mrf.mxu1  ;;  %5274 = vmatprep.mubr.msk.f32.mxu0 %vm5583_vm1, %v5582_v4 }
0x1974   : > { %5282 = vmatprep.subr.mxu0 %v5582_v4 }
0x1976   : > { %5275 = vmatmul.mubr.msk.f32.vlgmr.msra.gmra.mxu0 %vm422_vm2, %v3139_v50 }
0x1977   : > { %5284 = vmatprep.mubr.msk.f32.mxu0 %vm5583_vm1, %v5582_v4  ;;  %5283 = vmatpush3.msra.mxu0 %v4908_v14 }
0x1978   : > { %5292 = vmatprep.subr.mxu0 %v5582_v4 }
0x1a2e   : > { %v3134_v51 = vpop.f32.mrf.mxu1 }
0x1a30   : > { %v5271_v52 = vpop.f32.mrf.mxu1 }
0x1a32   : > { %v3061_v53 = vpop.f32.mrf.mxu0 }
0x1a33   : > { %v3135_v54 = vadd.f32 %v3134_v51, %v3061_v53 }
0x1a34   : > { %v5266_v55 = vpop.f32.mrf.mxu0 }
0x1a36   : > { %v3212_v35 = vpop.f32.mrf.mxu0 }
0x1a37   : > { %v3216_v56 = vsel %vm422_vm2, %v3212_v35, -inf }
0x1a38   : > { %3217 = vmax.xlane.f32.xlu1 %v3216_v56  ;;  %v5276_v58 = vpop.f32.mrf.mxu0  ;;  %v4910_v56 = vld [vmem:[%s6384_s3 + $0x60] sm:$0xff] }
0x1a49   : > { %3379 = vrot.lane.b32.xlu1 %v6070_v8, %s6412_s17 }
0x1a4d   : > { %3377 = vrot.lane.b32.xlu1 %v6070_v8, %s6413_s19 }
0x1ac1   : > { %v3218_v59 = vpop.xlane.xlu1 %3217 }
0x1ac2   : > { %v3219_v60 = vsub.f32 %v3212_v35, %v3218_v59 }
0x1ac4   : > { %v3220_v63 = vmul.f32 1.442695, %v3219_v60 }
0x1ac5   : > { %v3380_v9 = vpop.permute.xlu1 %3379 }
0x1ac6   : > { %5492 = vpow2.f32 %v3220_v63 }
0x1ac9   : > { %v3378_v10 = vpop.permute.xlu1 %3377 }
0x1ad3   : > { %v5493_v0 = vpop.eup %5492 }
0x1ad4   : > { %v3222_v1 = vsel %vm422_vm2, %v5493_v0, 0.0 }
0x1ad5   : > { %3223 = vadd.xlane.f32.xlu0 %v3222_v1 }
0x1aeb   : > { %3227 = vrot.lane.b32.xlu0 %v6070_v8, %s6414_s22 }
0x1b5e   : > { %v3224_v2 = vpop.xlane.xlu0 %3223 }
0x1b5f   : > { %5494 = vrcp.f32 %v3224_v2 }
0x1b62   : > { %v3228_v3 = vpop.permute.xlu0 %3227 }
0x1b63   : > { %5278 = vmatpush3.msra.mxu1 %v3228_v3 }
0x1b64   : > { %5287 = vmatprep.subr.mxu1 %v5582_v4 }
0x1b6c   : > { %v5495_v7 = vpop.eup %5494 }
0x1b6d   : > { %v3226_v57 = vmul.f32 %v5495_v7, %v5493_v0 }
0x1b6f   : > { %5280 = vmatmul.mubr.msk.f32.vlgmr.msra.gmra.mxu1 %vm422_vm2, %v3226_v57 }
0x1b70   : > { %5288 = vmatpush3.xpose.msk.msra.mxu1 %vm422_vm2, %v3380_v9  ;;  %5289 = vmatprep.mubr.msk.f32.mxu1 %vm5583_vm1, %v5582_v4 }
0x1b71   : > { %5297 = vmatprep.subr.mxu1 %v5582_v4 }
0x1b73   : > { %5290 = vmatmul.mubr.msk.f32.vlgmr.msra.gmra.mxu1 %vm422_vm2, %v3378_v10 }
0x1b74   : > { %5299 = vmatprep.mubr.msk.f32.mxu1 %vm5583_vm1, %v5582_v4  ;;  %5298 = vmatpush3.msra.mxu1 %v4909_v6 }
0x1b75   : > { %5307 = vmatprep.subr.mxu1 %v5582_v4 }
0x1c2f   : > { %v3299_v17 = vpop.f32.mrf.mxu1 }
0x1c30   : > { %5285 = vmatmul.mubr.msk.f32.vlgmr.msra.gmra.mxu0 %vm422_vm2, %v3299_v17 }
0x1c31   : > { %v5281_v18 = vpop.f32.mrf.mxu1  ;;  %5294 = vmatprep.mubr.msk.f32.mxu0 %vm5583_vm1, %v5582_v4 }
0x1c33   : > { %v3451_v19 = vpop.f32.mrf.mxu1 }
0x1c34   : > { %v3455_v21 = vsel %vm422_vm2, %v3451_v19, -inf }
0x1c35   : > { %3456 = vmax.xlane.f32.xlu0 %v3455_v21  ;;  %v5291_v22 = vpop.f32.mrf.mxu1 }
0x1c4b   : > { %3466 = vrot.lane.b32.xlu0 %v6070_v8, %s6415_s26  ;;  %s6419_s26 = smov 8  }
0x1cbe   : > { %v3457_v23 = vpop.xlane.xlu0 %3456 }
0x1cbf   : > { %v3458_v26 = vsub.f32 %v3451_v19, %v3457_v23 }
0x1cc1   : > { %v3459_v27 = vmul.f32 1.442695, %v3458_v26  ;;  %v4911_v26 = vld [vmem:[%s6384_s3 + $0x68] sm:$0xff] }
0x1cc2   : > { %v3467_v28 = vpop.permute.xlu0 %3466 }
0x1cc3   : > { %5496 = vpow2.f32 %v3459_v27  ;;  %5293 = vmatpush3.msra.mxu0 %v3467_v28 }
0x1cc4   : > { %5302 = vmatprep.subr.mxu0 %v5582_v4 }
0x1cd0   : > { %v5497_v29 = vpop.eup %5496 }
0x1cd1   : > { %v3461_v30 = vsel %vm422_vm2, %v5497_v29, 0.0 }
0x1cd2   : > { %3462 = vadd.xlane.f32.xlu1 %v3461_v30 }
0x1ce3   : > { %3616 = vrot.lane.b32.xlu1 %v6070_v8, %s6416_s18 }
0x1cf0   : > { %v3372_v32 = vpop.f32.mrf.mxu0 }
0x1cf1   : > { %v3376_v33 = vadd.f32 %v3372_v32, %v3135_v54 }
0x1cf2   : > { %v5286_v34 = vpop.f32.mrf.mxu0 }
0x1d5b   : > { %v3463_v16 = vpop.xlane.xlu1 %3462 }
0x1d5c   : > { %5498 = vrcp.f32 %v3463_v16 }
0x1d5f   : > { %v3617_v38 = vpop.permute.xlu1 %3616 }
0x1d69   : > { %v5499_v13 = vpop.eup %5498 }
0x1d6a   : > { %v3465_v20 = vmul.f32 %v5499_v13, %v5497_v29 }
0x1d6c   : > { %5295 = vmatmul.mubr.msk.f32.vlgmr.msra.gmra.mxu0 %vm422_vm2, %v3465_v20 }
0x1d6d   : > { %5303 = vmatpush3.xpose.msk.msra.mxu0 %vm422_vm2, %v6164_v37  ;;  %5304 = vmatprep.mubr.msk.f32.mxu0 %vm5583_vm1, %v5582_v4 }
0x1d6e   : > { %5312 = vmatprep.subr.mxu0 %v5582_v4 }
0x1d70   : > { %5305 = vmatmul.mubr.msk.f32.vlgmr.msra.gmra.mxu0 %vm422_vm2, %v3617_v38 }
0x1d71   : > { %5314 = vmatprep.mubr.msk.f32.mxu0 %vm5583_vm1, %v5582_v4  ;;  %5313 = vmatpush3.msra.mxu0 %v4910_v56 }
0x1d72   : > { %5322 = vmatprep.subr.mxu0 %v5582_v4 }
0x1e2c   : > { %v3538_v15 = vpop.f32.mrf.mxu0 }
0x1e2d   : > { %5300 = vmatmul.mubr.msk.f32.vlgmr.msra.gmra.mxu1 %vm422_vm2, %v3538_v15 }
0x1e2e   : > { %v5296_v39 = vpop.f32.mrf.mxu0  ;;  %5309 = vmatprep.mubr.msk.f32.mxu1 %vm5583_vm1, %v5582_v4 }
0x1e30   : > { %v3689_v40 = vpop.f32.mrf.mxu0 }
0x1e31   : > { %v3693_v41 = vsel %vm422_vm2, %v3689_v40, -inf }
0x1e32   : > { %3694 = vmax.xlane.f32.xlu0 %v3693_v41  ;;  %v5306_v42 = vpop.f32.mrf.mxu0 }
0x1e48   : > { %3704 = vrot.lane.b32.xlu0 %v6164_v37, %s5585_s12  ;;  %s4965_s12 = sshll.u32 %s5666_s9, 7 }
0x1e4c   : > { %3854 = vrot.lane.b32.xlu0 %v6070_v8, %s6417_s24  ;;  %s294_s24 = sand.u32 1, %s5572_s28  }
0x1ebb   : > { %v3695_v43 = vpop.xlane.xlu0 %3694 }
0x1ebc   : > { %v3696_v44 = vsub.f32 %v3689_v40, %v3695_v43  ;;  %v4912_v43 = vld [vmem:[%s6384_s3 + $0x70] sm:$0xff] }
0x1ebe   : > { %v3697_v45 = vmul.f32 1.442695, %v3696_v44 }
0x1ebf   : > { %v3705_v46 = vpop.permute.xlu0 %3704 }
0x1ec0   : > { %5500 = vpow2.f32 %v3697_v45  ;;  %5308 = vmatpush3.msra.mxu1 %v3705_v46 }
0x1ec1   : > { %5317 = vmatprep.subr.mxu1 %v5582_v4 }
0x1ec3   : > { %v3855_v35 = vpop.permute.xlu0 %3854 }
0x1ecd   : > { %v5501_v47 = vpop.eup %5500 }
0x1ece   : > { %v3699_v48 = vsel %vm422_vm2, %v5501_v47, 0.0 }
0x1ecf   : > { %3700 = vadd.xlane.f32.xlu1 %v3699_v48 }
0x1ee0   : > { %3856 = vrot.lane.b32.xlu1 %v6164_v37, %s5584_s10  ;;  %s4859_s10 = sshll.u32 %s294_s24, 3 }
0x1eed   : > { %v3611_v49 = vpop.f32.mrf.mxu1 }
0x1eee   : > { %v3615_v50 = vadd.f32 %v3611_v49, %v3376_v33 }
0x1eef   : > { %v5301_v51 = vpop.f32.mrf.mxu1 }
0x1f58   : > { %v3701_v52 = vpop.xlane.xlu1 %3700 }
0x1f59   : > { %5502 = vrcp.f32 %v3701_v52 }
0x1f5c   : > { %v3857_v55 = vpop.permute.xlu1 %3856 }
0x1f66   : > { %v5503_v53 = vpop.eup %5502 }
0x1f67   : > { %v3703_v54 = vmul.f32 %v5503_v53, %v5501_v47 }
0x1f69   : > { %5310 = vmatmul.mubr.msk.f32.vlgmr.msra.gmra.mxu1 %vm422_vm2, %v3703_v54  ;;  %v4913_v54 = vld [vmem:[%s6384_s3 + $0x78] sm:$0xff] }
0x1f6a   : > { %5318 = vmatpush3.xpose.msk.msra.mxu1 %vm422_vm2, %v3857_v55  ;;  %5319 = vmatprep.mubr.msk.f32.mxu1 %vm5583_vm1, %v5582_v4 }
0x1f6b   : > { %5327 = vmatprep.subr.mxu1 %v5582_v4 }
0x1f6d   : > { %5320 = vmatmul.mubr.msk.f32.vlgmr.msra.gmra.mxu1 %vm422_vm2, %v3855_v35 }
0x1f6e   : > { %5329 = vmatprep.mubr.msk.f32.mxu1 %vm5583_vm1, %v5582_v4  ;;  %5328 = vmatpush3.msra.mxu1 %v4911_v26  ;;  %v4914_v26 = vld [vmem:[%s6385_s4 + $0x20] sm:$0xff] }
0x1f6f   : > { %5337 = vmatprep.subr.mxu1 %v5582_v4 }
0x2029   : > { %v3776_v58 = vpop.f32.mrf.mxu1 }
0x202a   : > { %5315 = vmatmul.mubr.msk.f32.vlgmr.msra.gmra.mxu0 %vm422_vm2, %v3776_v58 }
0x202b   : > { %v5311_v59 = vpop.f32.mrf.mxu1  ;;  %5324 = vmatprep.mubr.msk.f32.mxu0 %vm5583_vm1, %v5582_v4 }
0x202d   : > { %v3928_v60 = vpop.f32.mrf.mxu1 }
0x202e   : > { %v3932_v63 = vsel %vm422_vm2, %v3928_v60, -inf }
0x202f   : > { %3933 = vmax.xlane.f32.xlu1 %v3932_v63  ;;  %v5321_v0 = vpop.f32.mrf.mxu1 }
0x2040   : > { %4095 = vrot.lane.b32.xlu1 %v6164_v37, %s6411_s23 }
0x2044   : > { %4093 = vrot.lane.b32.xlu1 %v6070_v8, %s6418_s25  ;;  %s296_s25 = scalar_lea.vmem [#allocation2], %s4859_s10 }
0x20b8   : > { %v3934_v1 = vpop.xlane.xlu1 %3933 }
0x20b9   : > { %v3935_v2 = vsub.f32 %v3928_v60, %v3934_v1  ;;  %v6272_v1 = vld [vmem:[%s6388_s7 + $0x8] sm:$0x3f] }
0x20bb   : > { %v3936_v3 = vmul.f32 1.442695, %v3935_v2 }
0x20bc   : > { %v4096_v21 = vpop.permute.xlu1 %4095 }
0x20bd   : > { %5504 = vpow2.f32 %v3936_v3 }
0x20c0   : > { %v4094_v23 = vpop.permute.xlu1 %4093 }
0x20ca   : > { %v5505_v7 = vpop.eup %5504 }
0x20cb   : > { %v3938_v9 = vsel %vm422_vm2, %v5505_v7, 0.0 }
0x20cc   : > { %3939 = vadd.xlane.f32.xlu0 %v3938_v9 }
0x20e2   : > { %3943 = vrot.lane.b32.xlu0 %v6164_v37, %s5586_s13  ;;  %s4796_s13 = sshll.u32 %s296_s25, 4  ;;  %s4797_s13 = int_to_ptr.vmem [resolvable:$true] %s4796_s13 }
0x20e3   : > { %s5520_s18 = scalar_lea.vmem %s4797_s13, 128 }
0x20e4   : > { %p5521_p11 = scmp.ne.s32.totalorder %s4797_s13, %s5520_s18 }
0x20e6   : > { %p5522_p12 = pnand %p5521_p11, %p5683_p5 }
0x20e8   : > { %p5523_p13 = pneg %p5522_p12 }
0x20ea   : > { %v3849_v57 = vpop.f32.mrf.mxu0 }
0x20eb   : > { %v3853_v10 = vadd.f32 %v3849_v57, %v3615_v50 }
0x20ec   : > { %v5316_v14 = vpop.f32.mrf.mxu0 }
0x2155   : > { %v3940_v17 = vpop.xlane.xlu0 %3939 }
0x2156   : > { %5506 = vrcp.f32 %v3940_v17 }
0x2159   : > { %v3944_v18 = vpop.permute.xlu0 %3943 }
0x215a   : > { %5323 = vmatpush3.msra.mxu0 %v3944_v18 }
0x215b   : > { %5332 = vmatprep.subr.mxu0 %v5582_v4 }
0x2163   : > { %v5507_v19 = vpop.eup %5506 }
0x2164   : > { %v3942_v22 = vmul.f32 %v5507_v19, %v5505_v7  ;;  %v4575_v7 = vrot.slane %v6272_v1, %v5736_v12  ;;  %v4916_v12 = vld [vmem:[%s6385_s4 + $0x30] sm:$0xff] }
0x2166   : > { %5325 = vmatmul.mubr.msk.f32.vlgmr.msra.gmra.mxu0 %vm422_vm2, %v3942_v22 }
0x2167   : > { %5333 = vmatpush3.xpose.msk.msra.mxu0 %vm422_vm2, %v4096_v21  ;;  %5334 = vmatprep.mubr.msk.f32.mxu0 %vm5583_vm1, %v5582_v4 }
0x2168   : > { %5342 = vmatprep.subr.mxu0 %v5582_v4 }
0x216a   : > { %5335 = vmatmul.mubr.msk.f32.vlgmr.msra.gmra.mxu0 %vm422_vm2, %v4094_v23  ;;  %v4917_v23 = vld [vmem:[%s6385_s4 + $0x38] sm:$0xff] }
0x216b   : > { %5344 = vmatprep.mubr.msk.f32.mxu0 %vm5583_vm1, %v5582_v4  ;;  %5343 = vmatpush3.msra.mxu0 %v4912_v43 }
0x216c   : > { %5352 = vmatprep.subr.mxu0 %v5582_v4 }
0x2226   : > { %v4015_v27 = vpop.f32.mrf.mxu0 }
0x2227   : > { %5330 = vmatmul.mubr.msk.f32.vlgmr.msra.gmra.mxu1 %vm422_vm2, %v4015_v27  ;;  %v4926_v27 = vld [vmem:[%s6387_s6 + $0x78] sm:$0xff] }
0x2228   : > { %v5326_v28 = vpop.f32.mrf.mxu0  ;;  %5339 = vmatprep.mubr.msk.f32.mxu1 %vm5583_vm1, %v5582_v4 }
0x2229   : > { %v4925_v28 = vld [vmem:[%s6387_s6 + $0x70] sm:$0xff] }
0x222a   : > { %v4167_v29 = vpop.f32.mrf.mxu0 }
0x222b   : > { %v4171_v30 = vsel %vm422_vm2, %v4167_v29, -inf }
0x222c   : > { %4172 = vmax.xlane.f32.xlu0 %v4171_v30  ;;  %v5336_v32 = vpop.f32.mrf.mxu0  ;;  %v4923_v30 = vld [vmem:[%s6387_s6 + $0x60] sm:$0xff] }
0x222d   : > { %v4922_v32 = vld [vmem:[%s6387_s6 + $0x58] sm:$0xff] }
0x2242   : > { %4182 = vrot.lane.b32.xlu0 %v6164_v37, %s6409_s21  ;;  %s4794_s21 = scalar_lea.hbm %s6389_s8, %s4965_s12 }
0x2246   : > { %4332 = vrot.lane.b32.xlu0 %v6070_v8, %s6419_s26 }
0x22b5   : > { %v4173_v33 = vpop.xlane.xlu0 %4172 }
0x22b6   : > { %v4174_v34 = vsub.f32 %v4167_v29, %v4173_v33  ;;  %v4924_v29 = vld [vmem:[%s6387_s6 + $0x68] sm:$0xff] }
0x22b8   : > { %v4175_v16 = vmul.f32 1.442695, %v4174_v34 }
0x22b9   : > { %v4183_v36 = vpop.permute.xlu0 %4182 }
0x22ba   : > { %5508 = vpow2.f32 %v4175_v16  ;;  %5338 = vmatpush3.msra.mxu1 %v4183_v36  ;;  %v4593_v36 = vrot.slane %v6272_v1, %v2350_v24  ;;  %v4920_v24 = vld [vmem:[%s6387_s6 + $0x48] sm:$0xff] }
0x22bb   : > { %5347 = vmatprep.subr.mxu1 %v5582_v4 }
0x22bd   : > { %v4333_v42 = vpop.permute.xlu0 %4332 }
0x22c7   : > { %v5509_v13 = vpop.eup %5508 }
0x22c8   : > { %v4177_v20 = vsel %vm422_vm2, %v5509_v13, 0.0 }
0x22c9   : > { %4178 = vadd.xlane.f32.xlu1 %v4177_v20 }
0x22da   : > { %4334 = vrot.lane.b32.xlu1 %v6164_v37, %s6413_s19  ;;  %s4783_s19 = scalar_lea.sflag [#allocation3], %s294_s24 }
0x22e7   : > { %v4088_v38 = vpop.f32.mrf.mxu1 }
0x22e8   : > { %v4092_v6 = vadd.f32 %v4088_v38, %v3853_v10  ;;  %v4598_v38 = vrot.slane %v6272_v1, %v2355_v25  ;;  %v4919_v25 = vld [vmem:[%s6387_s6 + $0x40] sm:$0xff] }
0x22e9   : > { %v5331_v15 = vpop.f32.mrf.mxu1 }
0x2352   : > { %v4179_v39 = vpop.xlane.xlu1 %4178 }
0x2353   : > { %5510 = vrcp.f32 %v4179_v39  ;;  %v4921_v39 = vld [vmem:[%s6387_s6 + $0x50] sm:$0xff] }
0x2356   : > { %v4335_v41 = vpop.permute.xlu1 %4334 }
0x2360   : > { %v5511_v8 = vpop.eup %5510 }
0x2361   : > { %v4181_v40 = vmul.f32 %v5511_v8, %v5509_v13  ;;  %v4961_v8 = vld [vmem:[%s6386_s5 + $0x1] ss:$0 sm:$0xff] }
0x2363   : > { %5340 = vmatmul.mubr.msk.f32.vlgmr.msra.gmra.mxu1 %vm422_vm2, %v4181_v40 }
0x2364   : > { %5348 = vmatpush3.xpose.msk.msra.mxu1 %vm422_vm2, %v4335_v41  ;;  %5349 = vmatprep.mubr.msk.f32.mxu1 %vm5583_vm1, %v5582_v4 }
0x2365   : > { %5357 = vmatprep.subr.mxu1 %v5582_v4 }
0x2367   : > { %5350 = vmatmul.mubr.msk.f32.vlgmr.msra.gmra.mxu1 %vm422_vm2, %v4333_v42 }
0x2368   : > { %5359 = vmatprep.mubr.msk.f32.mxu1 %vm5583_vm1, %v5582_v4  ;;  %5358 = vmatpush3.msra.mxu1 %v4913_v54 }
0x2369   : > { %5373 = vmatprep.subr.mxu1 %v5582_v4 }
0x2423   : > { %v4254_v44 = vpop.f32.mrf.mxu1 }
0x2424   : > { %5345 = vmatmul.mubr.msk.f32.vlgmr.msra.gmra.mxu0 %vm422_vm2, %v4254_v44  ;;  %v4683_v44 = vrot.slane %v6272_v1, %v5837_v31  ;;  %v4774_v31 = vrot.slane %v6272_v1, %v2532_v61 }
0x2425   : > { %v5341_v45 = vpop.f32.mrf.mxu1  ;;  %5354 = vmatprep.mubr.msk.f32.mxu0 %vm5583_vm1, %v5582_v4 }
0x2427   : > { %v4406_v46 = vpop.f32.mrf.mxu1 }
0x2428   : > { %v4410_v47 = vsel %vm422_vm2, %v4406_v46, -inf }
0x2429   : > { %4411 = vmax.xlane.f32.xlu1 %v4410_v47  ;;  %v5351_v48 = vpop.f32.mrf.mxu1 }
0x24b2   : > { %v4412_v49 = vpop.xlane.xlu1 %4411 }
0x24b3   : > { %v4413_v50 = vsub.f32 %v4406_v46, %v4412_v49 }
0x24b5   : > { %v4414_v51 = vmul.f32 1.442695, %v4413_v50 }
0x24b7   : > { %5512 = vpow2.f32 %v4414_v51 }
0x24c4   : > { %v5513_v52 = vpop.eup %5512 }
0x24c5   : > { %v4416_v53 = vsel %vm422_vm2, %v5513_v52, 0.0 }
0x24c6   : > { %4417 = vadd.xlane.f32.xlu0 %v4416_v53 }
0x24dc   : > { %4421 = vrot.lane.b32.xlu0 %v6164_v37, %s6412_s17  ;;  %s5524_s17 = sshll.u32 %s5599_s20, 4  ;;  %s5525_s17 = int_to_ptr.vmem [resolvable:$false] %s5524_s17 }
0x24dd   : > { %s5526_s9 = scalar_lea.vmem %s5525_s17, 256  ;;  %p5527_p0 = scmp.lt.s32.totalorder %s4797_s13, %s5525_s17 }
0x24de   : > { %p5528_p1 = scmp.lt.s32.totalorder %s5526_s9, %s5520_s18 }
0x24e0   : > { %p5529_p2 = por %p5528_p1, %p5527_p0 }
0x24e2   : > { %p5530_p3 = pnand %p5529_p2, %p5523_p13 }
0x24e4   : > { %v4327_v55 = vpop.f32.mrf.mxu0 }
0x24e5   : > { %v4331_v35 = vadd.f32 %v4327_v55, %v4092_v6 }
0x24e6   : > { %v5346_v56 = vpop.f32.mrf.mxu0 }
0x254f   : > { %v4418_v58 = vpop.xlane.xlu0 %4417 }
0x2550   : > { %5514 = vrcp.f32 %v4418_v58 }
0x2553   : > { %v4422_v59 = vpop.permute.xlu0 %4421 }
0x2554   : > { %5353 = vmatpush3.msra.mxu0 %v4422_v59  ;;  %v4779_v59 = vrot.slane %v6272_v1, %v2537_v62 }
0x2555   : > { %5362 = vmatprep.subr.mxu0 %v5582_v4 }
0x255d   : > { %v5515_v60 = vpop.eup %5514 }
0x255e   : > { %v4420_v63 = vmul.f32 %v5515_v60, %v5513_v52 }
0x2560   : > { %5355 = vmatmul.mubr.msk.f32.vlgmr.msra.gmra.mxu0 %vm422_vm2, %v4420_v63 }
0x2561   : > { %5370 = vmatprep.mubr.msk.f32.mxu0 %vm5583_vm1, %v5582_v4  ;;  %5363 = vmatpush3.msra.mxu0 %v4917_v23 }
0x2562   : > { %5364 = vmatprep.subr.mxu0 %v5582_v4 }
0x2563   : > { %5365 = vmatpush3.msra.mxu0 %v4916_v12 }
0x2564   : > { %5366 = vmatprep.subr.mxu0 %v5582_v4 }
0x2620   : > { %v4493_v37 = vpop.f32.mrf.mxu0 }
0x2621   : > { %5360 = vmatmul.mubr.msk.f32.vlgmr.msra.gmra.mxu1 %vm422_vm2, %v4493_v37 }
0x2622   : > { %v5356_v0 = vpop.f32.mrf.mxu0  ;;  %5389 = vmatprep.mubr.msk.f32.mxu1 %vm5583_vm1, %v5582_v4  ;;  %5374 = vmatpush3.msra.mxu1 %v4926_v27 }
0x2623   : > { %5375 = vmatprep.subr.mxu1 %v5582_v4 }
0x2624   : > { %5376 = vmatpush3.msra.mxu1 %v4925_v28 }
0x2625   : > { %5377 = vmatprep.subr.mxu1 %v5582_v4 }
0x2626   : > { %5378 = vmatpush3.msra.mxu1 %v4924_v29 }
0x2627   : > { %5379 = vmatprep.subr.mxu1 %v5582_v4 }
0x2628   : > { %5380 = vmatpush3.msra.mxu1 %v4923_v30 }
0x2629   : > { %5381 = vmatprep.subr.mxu1 %v5582_v4 }
0x262a   : > { %5382 = vmatpush3.msra.mxu1 %v4922_v32 }
0x262b   : > { %5383 = vmatprep.subr.mxu1 %v5582_v4 }
0x262c   : > { %5384 = vmatpush3.msra.mxu1 %v4921_v39 }
0x262d   : > { %5385 = vmatprep.subr.mxu1 %v5582_v4 }
0x262e   : > { %5386 = vmatpush3.msra.mxu1 %v4920_v24 }
0x262f   : > { %5387 = vmatprep.subr.mxu1 %v5582_v4 }
0x2630   : > { %5388 = vmatpush3.msra.mxu1 %v4919_v25 }
0x26e1   : > { %v4566_v2 = vpop.f32.mrf.mxu1 }
0x26e2   : > { %v4570_v3 = vadd.f32 %v4566_v2, %v4331_v35 }
0x26e3   : > { %v5361_v9 = vpop.f32.mrf.mxu1 }
0x26e4   : > { %v4571_v57 = vadd.f32 %v4570_v3, %v6057_v5  ;;  %v4915_v5 = vld [vmem:[%s6385_s4 + $0x28] sm:$0xff] }
0x26e5   : > { %5367 = vmatpush3.msra.mxu0 %v4915_v5 }
0x26e6   : > { %v4576_v10 = vadd.f32 %v4575_v7, %v4571_v57  ;;  %5368 = vmatprep.subr.mxu0 %v5582_v4 }
0x26e7   : > { %5369 = vmatpush3.msra.mxu0 %v4914_v26 }
0x26e8   : > { %v4577_v14 = vsel %vm344_vm0, %v4576_v10, 0.0 }
0x26e9   : > { %4578 = vadd.xlane.f32.xlu1 %v4577_v14 }
0x2772   : > { %v4579_v17 = vpop.xlane.xlu1 %4578 }
0x2773   : > { %v4580_v18 = vmul.f32 0.03125, %v4579_v17 }
0x2775   : > { %v4581_v19 = vsub.f32 %v4576_v10, %v4580_v18 }
0x2777   : > { %v4582_v21 = vmul.f32 %v4581_v19, %v4581_v19 }
0x2779   : > { %v4583_v22 = vsel %vm344_vm0, %v4582_v21, 0.0 }
0x277a   : > { %4584 = vadd.xlane.f32.xlu1 %v4583_v22 }
0x2803   : > { %v4585_v33 = vpop.xlane.xlu1 %4584 }
0x2804   : > { %v4586_v34 = vmul.f32 0.03125, %v4585_v33 }
0x2806   : > { %v4587_v16 = vadd.f32 1e-05, %v4586_v34 }
0x2808   : > { %5516 = vrsqrt.f32 %v4587_v16 }
0x2815   : > { %v5517_v13 = vpop.eup %5516 }
0x2816   : > { %v4589_v20 = vmul.f32 %v5517_v13, %v4581_v19 }
0x2818   : > { %v4594_v6 = vmul.f32 %v4593_v36, %v4589_v20 }
0x281a   : > { %v4599_v15 = vadd.f32 %v4598_v38, %v4594_v6 }
0x281c   : > { %5371 = vmatmul.mubr.msk.f32.vlgmr.msra.gmra.mxu0 %vm344_vm0, %v4599_v15 }
0x28dc   : > { %v4675_v40 = vpop.f32.mrf.mxu0 }
0x28dd   : > { %v4676_v41 = vadd.f32 %v4961_v8, %v4675_v40 }
0x28de   : > { %v5372_v42 = vpop.f32.mrf.mxu0 }
0x28df   : > { %v4679_v43 = vmax.f32 %v4676_v41, 0.0 }
0x28e1   : > { %5390 = vmatmul.mubr.msk.f32.vlgmr.msra.gmra.mxu1 %vm2442_vm3, %v4679_v43 }
0x29a1   : > { %v4753_v45 = vpop.f32.mrf.mxu1 }
0x29a2   : > { %v4754_v46 = vadd.f32 %v4753_v45, %v4683_v44 }
0x29a3   : > { %v5391_v47 = vpop.f32.mrf.mxu1 }
0x29a4   : > { %v4757_v48 = vadd.f32 %v4754_v46, %v4599_v15 }
0x29a6   : > { %v4758_v4 = vsel %vm344_vm0, %v4757_v48, 0.0 }
0x29a7   : > { %4759 = vadd.xlane.f32.xlu1 %v4758_v4 }
0x2a30   : > { %v4760_v49 = vpop.xlane.xlu1 %4759 }
0x2a31   : > { %v4761_v50 = vmul.f32 0.03125, %v4760_v49 }
0x2a33   : > { %v4762_v51 = vsub.f32 %v4757_v48, %v4761_v50 }
0x2a35   : > { %v4763_v52 = vmul.f32 %v4762_v51, %v4762_v51 }
0x2a37   : > { %v4764_v53 = vsel %vm344_vm0, %v4763_v52, 0.0 }
0x2a38   : > { %4765 = vadd.xlane.f32.xlu1 %v4764_v53 }
0x2ac1   : > { %v4766_v54 = vpop.xlane.xlu1 %4765 }
0x2ac2   : > { %v4767_v55 = vmul.f32 0.03125, %v4766_v54 }
0x2ac4   : > { %v4768_v35 = vadd.f32 1e-05, %v4767_v55 }
0x2ac6   : > { %5518 = vrsqrt.f32 %v4768_v35 }
0x2ad3   : > { %v5519_v56 = vpop.eup %5518 }
0x2ad4   : > { %v4770_v58 = vmul.f32 %v5519_v56, %v4762_v51 }
0x2ad6   : > { %v4775_v60 = vmul.f32 %v4774_v31, %v4770_v58 }
0x2ad8   : > { %v4780_v63 = vadd.f32 %v4779_v59, %v4775_v60 }
0x2ada   : > { %4781 = vst.msk [vmem:[%s296_s25] sm:$0xff] %vm344_vm0, %v4780_v63 }
0x2adb   : > { %5533 = shalt.err (!%p5530_p3)
}
0x2adc   : > { %s5534_s22 = scalar_lea.hbm %s4794_s21, 128  ;;  %s5538_s12 = scalar_lea.hbm %s6389_s8, 256 }
0x2add   : > { %p5535_p4 = scmp.ne.s32.totalorder %s4794_s21, %s5534_s22  ;;  %p5539_p9 = scmp.lt.s32.totalorder %s4794_s21, %s6389_s8 }
0x2ade   : > { %p5540_p10 = scmp.lt.s32.totalorder %s5538_s12, %s5534_s22 }
0x2adf   : > { %p5536_p7 = pnand %p5535_p4, %p5683_p5 }
0x2ae0   : > { %p5541_p11 = por %p5540_p10, %p5539_p9 }
0x2ae1   : > { %p5537_p8 = pneg %p5536_p7 }
0x2ae3   : > { %p5542_p12 = pnand %p5541_p11, %p5537_p8 }
0x2ae5   : > { %5545 = shalt.err (!%p5542_p12)
}
0x2ae6   : > { %5392 = dma.vmem_to_hbm [thread:$0]  (%p5683_p5), %s4797_s13, 128, %s4794_s21, %s4783_s19  }
0x2ae7 PF: > { %p5398_p13 = scmp.ge.s32.totalorder %s5580_s30, 2  ;;  %s4808_s26 = sand.u32 1, %s5568_s27  }
0x2ae8   : > { %s4809_s18 = scalar_lea.sflag [#allocation3], %s4808_s26 }
0x2ae9   : > { %p5395_p0 = pnand %p5398_p13, %p5687_p6 }
0x2aeb   : > { %p5396_p1 = pneg %p5395_p0 }
0x2aed   : > { %5563 = dma.done.wait (%p5396_p1), %s4809_s18, 128  }
0x2aee   : > { %5565 = vsyncadd (%p5396_p1), %s4809_s18, 4294967168  ;;  %p18_p2 = scmp.ge.s32.totalorder %s5670_s11, 4   ;;  %s6420_s27 = smov %s5572_s28 }
0x2aef   : > { %s6421_s28 = smov %s5576_s29  ;;  %s6422_s29 = smov %s5681_s14 }
0x2af0   : > { %s6423_s30 = smov %s5670_s11  ;;  %20 = sbr.rel (!%p18_p2) target bundleno = 3 (0x3), region = 94 }
0x2af5   :  { %4814 = vsyncpa [#allocation3], 1 }
0x2af6   :  { %4816 = vsyncpa [#allocation3 + $0x1], 1 }

</bundles_post_ra>
